<compile_context>
chip_gen: v7x
topology: tpu7x:2x2x1
jax: 0.10.0
libtpu: 0.0.40
codegen_flags: <defaults>
</compile_context>

<pallas_src>
import functools

import jax
import jax.numpy as jnp
from jax.experimental import pallas as pl
from jax.experimental.pallas import tpu as pltpu

IN_FEATURES = 7          # len(['batch', 'channels', 'image_size']) + 4
NUM_LAYERS = 2           # MLPBase depth (small, synthetic)
LAYER_SIZE = 32          # hidden width (small, synthetic)
MAX_TILE_BATCH = 8192    # lane-tile cap (multiple of 128)
MIN_PALLAS_BATCH = 1024  # below this, the XLA-fused forward wins


def _round_up(x, m):
    return ((x + m - 1) // m) * m


def _choose_tile_batch(batch, max_tile=MAX_TILE_BATCH):
    """Adaptive batch tile: as large as useful, but >= 2 grid steps when possible."""
    padded = _round_up(batch, 128)
    if padded <= 256:
        return padded                              # tiny: one tile, no split
    # Prefer >= 2 tiles so dimension_semantics=("parallel",) has something to
    # shard across v7x's two TensorCores; cap so the (L, TB) intermediates don't
    # become the next vld/vst cost.
    half = _round_up(pl.cdiv(padded, 2), 128)
    return min(max_tile, half)


def _mlp_kernel(x_ref, w1_ref, b1_ref, wm_ref, bm_ref, w2_ref, b2_ref, o_ref,
                *, num_layers):
    # x_ref : (TB, IN)  native row-major tile (fully contiguous in HBM)
    # w1    : (L, IN)            b1 : (L, 1)
    # wm    : (num_layers, L, L) bm : (num_layers, L, 1)
    # w2    : (L, 1)             b2 : (1, 1)        o_ref : (1, TB)
    #
    # fc1 as an "NT" contraction: (L, IN) . (TB, IN)^T -> (L, TB). Batch lands on
    # the lane axis without any wrapper-side transpose or padding traffic.
    h = jax.lax.dot_general(
        w1_ref[...], x_ref[...],
        dimension_numbers=(((1,), (1,)), ((), ())),
        preferred_element_type=jnp.float32)
    h = jnp.maximum(h + b1_ref[...], 0.0)          # bias broadcast over lanes (VPU)

    # MLPBase: num_layers x (Linear + ReLU); small, static unroll.
    for i in range(num_layers):
        h = jnp.dot(wm_ref[i], h, preferred_element_type=jnp.float32)
        h = jnp.maximum(h + bm_ref[i], 0.0)

    # fc2 off the MXU: only 1 of the MXU's 128/256 result rows would be useful,
    # so do (L,1)*(L,TB) on the VPU and a sublane reduce on the XLU -> (1, TB).
    out = jnp.sum(w2_ref[...] * h, axis=0, keepdims=True) + b2_ref[...]
    o_ref[...] = out.astype(o_ref.dtype)


def batchnorm_forward(x, params, *, num_layers=NUM_LAYERS,
                      min_pallas_batch=MIN_PALLAS_BATCH):
    """Forward pass of the habitat `BatchNorm` MLP head. Returns (batch, 1)."""
    w1, b1, wm, bm, w2, b2 = params
    batch, in_features = x.shape
    layer_size = w1.shape[0]

    if batch < min_pallas_batch:
        # Dispatch threshold: tiny batches are better served by the fused XLA MLP.
        return reference_forward(x, params, num_layers=num_layers)

    tile_batch = _choose_tile_batch(batch)
    num_tiles = pl.cdiv(batch, tile_batch)

    grid_spec = pltpu.PrefetchScalarGridSpec(
        num_scalar_prefetch=0,
        grid=(num_tiles,),
        in_specs=[
            pl.BlockSpec((tile_batch, in_features), lambda i: (i, 0)),   # x (streamed)
            pl.BlockSpec((layer_size, in_features), lambda i: (0, 0)),   # fc1.weight
            pl.BlockSpec((layer_size, 1), lambda i: (0, 0)),             # fc1.bias
            pl.BlockSpec((num_layers, layer_size, layer_size),
                         lambda i: (0, 0, 0)),                           # mlp weights
            pl.BlockSpec((num_layers, layer_size, 1),
                         lambda i: (0, 0, 0)),                           # mlp biases
            pl.BlockSpec((layer_size, 1), lambda i: (0, 0)),             # fc2.weight (column)
            pl.BlockSpec((1, 1), lambda i: (0, 0)),                      # fc2.bias
        ],
        out_specs=pl.BlockSpec((1, tile_batch), lambda i: (0, i)),
    )

    out_t = pl.pallas_call(
        functools.partial(_mlp_kernel, num_layers=num_layers),
        out_shape=jax.ShapeDtypeStruct((1, batch), jnp.float32),
        grid_spec=grid_spec,
        compiler_params=pltpu.CompilerParams(
            dimension_semantics=("parallel",)),   # shard batch tiles across TCs (v7x)
    )(x, w1, b1, wm, bm, w2, b2)

    # Back to the PyTorch (batch, 1) layout; transposing (1, batch) is free.
    return out_t.T


def init_params(key, in_features=IN_FEATURES, layer_size=LAYER_SIZE,
                num_layers=NUM_LAYERS):
    """PyTorch-Linear-style init: U(-1/sqrt(fan_in), 1/sqrt(fan_in)).

    fc1 / hidden weights keep the native PyTorch (out_features, in_features)
    layout; biases are (out_features, 1) columns so they broadcast over the lane
    (batch) axis; fc2.weight is stored transposed as a (L, 1) column so the kernel
    never transposes anything.
    """
    ks = jax.random.split(key, 6)

    def uni(k, shape, fan_in):
        bound = 1.0 / jnp.sqrt(float(fan_in))
        return jax.random.uniform(k, shape, jnp.float32, -bound, bound)

    w1 = uni(ks[0], (layer_size, in_features), in_features)              # fc1.weight
    b1 = uni(ks[1], (layer_size, 1), in_features)                        # fc1.bias
    wm = uni(ks[2], (num_layers, layer_size, layer_size), layer_size)    # mlp weights
    bm = uni(ks[3], (num_layers, layer_size, 1), layer_size)             # mlp biases
    w2 = uni(ks[4], (layer_size, 1), layer_size)                         # fc2.weight^T
    b2 = uni(ks[5], (1, 1), layer_size)                                  # fc2.bias
    return (w1, b1, wm, bm, w2, b2)


def reference_forward(x, params, num_layers=NUM_LAYERS):
    """Plain-JAX reference mirroring the PyTorch forward (row-major batch)."""
    w1, b1, wm, bm, w2, b2 = params
    h = jnp.maximum(x @ w1.T + b1[:, 0], 0.0)
    for i in range(num_layers):
        h = jnp.maximum(h @ wm[i].T + bm[i, :, 0], 0.0)
    return h @ w2 + b2            # (batch, L) @ (L, 1) + (1, 1) -> (batch, 1)


if __name__ == "__main__":
    key = jax.random.PRNGKey(0)
    k_x, k_p = jax.random.split(key)
    params = init_params(k_p)

    # Pallas path: batch above the dispatch threshold, not a multiple of the tile
    # (exercises the ragged last grid step) and >= 2 grid steps (v7x-friendly),
    # yet still tiny in absolute bytes (3000 x 7 f32 = 84 KiB).
    BATCH = 3000
    x = jax.random.normal(k_x, (BATCH, IN_FEATURES), dtype=jnp.float32)
    out = jax.block_until_ready(batchnorm_forward(x, params))
    ref = reference_forward(x, params)
    assert out.shape == (BATCH, 1), out.shape
    assert jnp.allclose(out, ref, atol=1e-4, rtol=1e-4), float(
        jnp.max(jnp.abs(out - ref)))

    # Small-batch dispatch threshold: falls back to the fused pure-JAX forward.
    x_small = x[:8]
    out_small = jax.block_until_ready(batchnorm_forward(x_small, params))
    assert out_small.shape == (8, 1), out_small.shape
    assert jnp.allclose(out_small, ref[:8], atol=1e-4, rtol=1e-4)

    print("KERNEL_OK")
</pallas_src>

<mosaic_0001>
module attributes {stable_mosaic.version = 11 : i64} {
  func.func @_mlp_kernel(%arg0: i32, %arg1: memref<1536x7xf32, #tpu.memory_space<vmem>>, %arg2: memref<32x7xf32, #tpu.memory_space<vmem>>, %arg3: memref<32x1xf32, #tpu.memory_space<vmem>>, %arg4: memref<2x32x32xf32, #tpu.memory_space<vmem>>, %arg5: memref<2x32x1xf32, #tpu.memory_space<vmem>>, %arg6: memref<32x1xf32, #tpu.memory_space<vmem>>, %arg7: memref<1x1xf32, #tpu.memory_space<vmem>>, %arg8: memref<1x1536xf32, #tpu.memory_space<vmem>>) attributes {dimension_semantics = [#tpu.dimension_semantics<parallel>], iteration_bounds = array<i64: 2>, scalar_prefetch = 0 : i64, scratch_operands = 0 : i64, tpu.core_type = #tpu.core_type<tc>, window_params = [{transform_indices = @transform_0, window_bounds = array<i64: 1536, 7>}, {pipeline_mode = #tpu.pipeline_mode<synchronous>, transform_indices = @transform_1, window_bounds = array<i64: 32, 7>}, {pipeline_mode = #tpu.pipeline_mode<synchronous>, transform_indices = @transform_2, window_bounds = array<i64: 32, 1>}, {pipeline_mode = #tpu.pipeline_mode<synchronous>, transform_indices = @transform_3, window_bounds = array<i64: 2, 32, 32>}, {pipeline_mode = #tpu.pipeline_mode<synchronous>, transform_indices = @transform_4, window_bounds = array<i64: 2, 32, 1>}, {pipeline_mode = #tpu.pipeline_mode<synchronous>, transform_indices = @transform_5, window_bounds = array<i64: 32, 1>}, {pipeline_mode = #tpu.pipeline_mode<synchronous>, transform_indices = @transform_6, window_bounds = array<i64: 1, 1>}, {transform_indices = @transform_7, window_bounds = array<i64: 1, 1536>}]} {
    %c0 = arith.constant 0 : index
    %c0_0 = arith.constant 0 : index
    %0 = vector.load %arg2[%c0, %c0_0] : memref<32x7xf32, #tpu.memory_space<vmem>>, vector<32x7xf32>
    %c0_1 = arith.constant 0 : index
    %c0_2 = arith.constant 0 : index
    %1 = vector.load %arg1[%c0_1, %c0_2] : memref<1536x7xf32, #tpu.memory_space<vmem>>, vector<1536x7xf32>
    %cst = arith.constant dense<0.000000e+00> : vector<32x1536xf32>
    %2 = tpu.matmul %0, %1, %cst {dimension_numbers = #tpu.dot_dimension_numbers<[1], [1], [0], [0], [0, 0, 1, 0], [], []>} : vector<32x7xf32>, vector<1536x7xf32>, vector<32x1536xf32> -> vector<32x1536xf32>
    %c0_3 = arith.constant 0 : index
    %c0_4 = arith.constant 0 : index
    %3 = vector.load %arg3[%c0_3, %c0_4] : memref<32x1xf32, #tpu.memory_space<vmem>>, vector<32x1xf32>
    %4 = vector.broadcast %3 : vector<32x1xf32> to vector<32x1536xf32>
    %5 = arith.addf %2, %4 : vector<32x1536xf32>
    %cst_5 = arith.constant 0.000000e+00 : f32
    %6 = vector.broadcast %cst_5 : f32 to vector<32x1536xf32>
    %7 = arith.maximumf %5, %6 : vector<32x1536xf32>
    %c0_6 = arith.constant 0 : index
    %c0_7 = arith.constant 0 : index
    %c0_8 = arith.constant 0 : index
    %8 = vector.load %arg4[%c0_6, %c0_7, %c0_8] : memref<2x32x32xf32, #tpu.memory_space<vmem>>, vector<1x32x32xf32>
    %9 = vector.shape_cast %8 : vector<1x32x32xf32> to vector<32x32xf32>
    %cst_9 = arith.constant dense<0.000000e+00> : vector<32x1536xf32>
    %10 = tpu.matmul %9, %7, %cst_9 {dimension_numbers = #tpu.dot_dimension_numbers<[1], [0], [0], [1], [0, 0, 1, 1], [], []>} : vector<32x32xf32>, vector<32x1536xf32>, vector<32x1536xf32> -> vector<32x1536xf32>
    %c0_10 = arith.constant 0 : index
    %c0_11 = arith.constant 0 : index
    %c0_12 = arith.constant 0 : index
    %11 = vector.load %arg5[%c0_10, %c0_11, %c0_12] : memref<2x32x1xf32, #tpu.memory_space<vmem>>, vector<1x32x1xf32>
    %12 = vector.shape_cast %11 : vector<1x32x1xf32> to vector<32x1xf32>
    %13 = vector.broadcast %12 : vector<32x1xf32> to vector<32x1536xf32>
    %14 = arith.addf %10, %13 : vector<32x1536xf32>
    %cst_13 = arith.constant 0.000000e+00 : f32
    %15 = vector.broadcast %cst_13 : f32 to vector<32x1536xf32>
    %16 = arith.maximumf %14, %15 : vector<32x1536xf32>
    %c1 = arith.constant 1 : index
    %c0_14 = arith.constant 0 : index
    %c0_15 = arith.constant 0 : index
    %17 = vector.load %arg4[%c1, %c0_14, %c0_15] : memref<2x32x32xf32, #tpu.memory_space<vmem>>, vector<1x32x32xf32>
    %18 = vector.shape_cast %17 : vector<1x32x32xf32> to vector<32x32xf32>
    %cst_16 = arith.constant dense<0.000000e+00> : vector<32x1536xf32>
    %19 = tpu.matmul %18, %16, %cst_16 {dimension_numbers = #tpu.dot_dimension_numbers<[1], [0], [0], [1], [0, 0, 1, 1], [], []>} : vector<32x32xf32>, vector<32x1536xf32>, vector<32x1536xf32> -> vector<32x1536xf32>
    %c1_17 = arith.constant 1 : index
    %c0_18 = arith.constant 0 : index
    %c0_19 = arith.constant 0 : index
    %20 = vector.load %arg5[%c1_17, %c0_18, %c0_19] : memref<2x32x1xf32, #tpu.memory_space<vmem>>, vector<1x32x1xf32>
    %21 = vector.shape_cast %20 : vector<1x32x1xf32> to vector<32x1xf32>
    %22 = vector.broadcast %21 : vector<32x1xf32> to vector<32x1536xf32>
    %23 = arith.addf %19, %22 : vector<32x1536xf32>
    %cst_20 = arith.constant 0.000000e+00 : f32
    %24 = vector.broadcast %cst_20 : f32 to vector<32x1536xf32>
    %25 = arith.maximumf %23, %24 : vector<32x1536xf32>
    %c0_21 = arith.constant 0 : index
    %c0_22 = arith.constant 0 : index
    %26 = vector.load %arg6[%c0_21, %c0_22] : memref<32x1xf32, #tpu.memory_space<vmem>>, vector<32x1xf32>
    %27 = vector.broadcast %26 : vector<32x1xf32> to vector<32x1536xf32>
    %28 = arith.mulf %27, %25 : vector<32x1536xf32>
    %cst_23 = arith.constant dense<0.000000e+00> : vector<1536xf32>
    %29 = vector.multi_reduction <add>, %28, %cst_23 [0] : vector<32x1536xf32> to vector<1536xf32>
    %30 = vector.shape_cast %29 : vector<1536xf32> to vector<1x1536xf32>
    %c0_24 = arith.constant 0 : index
    %c0_25 = arith.constant 0 : index
    %31 = vector.load %arg7[%c0_24, %c0_25] : memref<1x1xf32, #tpu.memory_space<vmem>>, vector<1x1xf32>
    %32 = vector.broadcast %31 : vector<1x1xf32> to vector<1x1536xf32>
    %33 = arith.addf %30, %32 : vector<1x1536xf32>
    %c0_26 = arith.constant 0 : index
    %c0_27 = arith.constant 0 : index
    %34 = vector.load %arg8[%c0_26, %c0_27] : memref<1x1536xf32, #tpu.memory_space<vmem>>, vector<1x1536xf32>
    tpu.vector_store %arg8[%c0_26, %c0_27], %33 {strides = array<i32>} : memref<1x1536xf32, #tpu.memory_space<vmem>>, vector<1x1536xf32>,
    return
  }
  func.func @transform_0(%arg0: i32) -> (i32, i32) {
    %c0_i32 = arith.constant 0 : i32
    %c0_i32_0 = arith.constant 0 : i32
    return %arg0, %c0_i32 : i32, i32
  }
  func.func @transform_1(%arg0: i32) -> (i32, i32) {
    %c0_i32 = arith.constant 0 : i32
    %c0_i32_0 = arith.constant 0 : i32
    %c0_i32_1 = arith.constant 0 : i32
    return %c0_i32, %c0_i32_0 : i32, i32
  }
  func.func @transform_2(%arg0: i32) -> (i32, i32) {
    %c0_i32 = arith.constant 0 : i32
    %c0_i32_0 = arith.constant 0 : i32
    %c0_i32_1 = arith.constant 0 : i32
    return %c0_i32, %c0_i32_0 : i32, i32
  }
  func.func @transform_3(%arg0: i32) -> (i32, i32, i32) {
    %c0_i32 = arith.constant 0 : i32
    %c0_i32_0 = arith.constant 0 : i32
    %c0_i32_1 = arith.constant 0 : i32
    %c0_i32_2 = arith.constant 0 : i32
    return %c0_i32, %c0_i32_0, %c0_i32_1 : i32, i32, i32
  }
  func.func @transform_4(%arg0: i32) -> (i32, i32, i32) {
    %c0_i32 = arith.constant 0 : i32
    %c0_i32_0 = arith.constant 0 : i32
    %c0_i32_1 = arith.constant 0 : i32
    %c0_i32_2 = arith.constant 0 : i32
    return %c0_i32, %c0_i32_0, %c0_i32_1 : i32, i32, i32
  }
  func.func @transform_5(%arg0: i32) -> (i32, i32) {
    %c0_i32 = arith.constant 0 : i32
    %c0_i32_0 = arith.constant 0 : i32
    %c0_i32_1 = arith.constant 0 : i32
    return %c0_i32, %c0_i32_0 : i32, i32
  }
  func.func @transform_6(%arg0: i32) -> (i32, i32) {
    %c0_i32 = arith.constant 0 : i32
    %c0_i32_0 = arith.constant 0 : i32
    %c0_i32_1 = arith.constant 0 : i32
    return %c0_i32, %c0_i32_0 : i32, i32
  }
  func.func @transform_7(%arg0: i32) -> (i32, i32) {
    %c0_i32 = arith.constant 0 : i32
    %c0_i32_0 = arith.constant 0 : i32
    return %c0_i32, %arg0 : i32, i32
  }
}

</mosaic_0001>

<bundles_post_ra>
// kernel: tpu_custom_call.1
= control target key start
LH: loop header
LB: loop body
LE: loop exit
PB: predicated region body
PF: predicated region fallthrough
CT: control target
= control target key end

     0   :  { %s5478_s0 = inlined_call_operand.vmem [shape: f32[3000,7], index: 0, kind: input, shape index: {}]   ;;  %s5479_s1 = inlined_call_operand.vmem [shape: f32[32,7], index: 1, kind: input, shape index: {}]   ;;  %s5480_s2 = inlined_call_operand.vmem [shape: f32[32,1], index: 2, kind: input, shape index: {}]   ;;  %s5481_s3 = inlined_call_operand.vmem [shape: f32[2,32,32], index: 3, kind: input, shape index: {}]   ;;  %s5482_s4 = inlined_call_operand.vmem [shape: f32[2,32,1], index: 4, kind: input, shape index: {}]   ;;  %s5483_s5 = inlined_call_operand.vmem [shape: f32[32,1], index: 5, kind: input, shape index: {}]   ;;  %s5484_s6 = inlined_call_operand.<no memory space> [shape: f32[1,1], index: 6, kind: input, shape index: {}]   ;;  %s5485_s7 = inlined_call_operand.hbm [shape: f32[1,3000], index: 7, kind: output, shape index: {}]  }
   0x1   :  { %v12_v0 = vstv %s5484_s6 }
   0x2   :  { %13 = vst [vmem:[#allocation2] sm:$0x1] %v12_v0 }
   0x3   :  { %14 = vsyncpa [#allocation4], 0 }
   0x4   :  { %16 = vsyncpa [#allocation4 + $0x1], 0  ;;  %s4370_s26 = smov 0   ;;  %s4372_s27 = smov 0  }
   0x5   :  { %s4374_s28 = smov 0   ;;  %s4376_s29 = smov 0  }
   0x6 LB: > { %s3308_s6 = sadd.s32 4294967295, %s4321_s29   ;;  %s3309_s30 = sadd.s32 4294967294, %s4321_s29   ;;  %s4321_s29 = sphi %s4376_s29, %s5493_s29   ;;  %s4317_s28 = sphi %s4374_s28, %s5492_s28   ;;  %s4313_s27 = sphi %s4372_s27, %s5491_s27   ;;  %s4309_s26 = sphi %s4370_s26, %s5490_s26  }
   0x7   : > { %s4393_s8 = sadd.s32 1, %s4321_s29   ;;  %s181_s9 = sadd.s32 1, %s4317_s28 }
   0x8   : > { %s178_s10 = ssub.s32 %s4321_s29, %s4393_s8  ;;  %p191_p0 = scmp.ne.s32.totalorder %s4317_s28, %s4313_s27 }
   0x9   : > { %p179_p1 = scmp.eq.s32.totalorder %s178_s10, 0  ;;  %p192_p2 = scmp.eq.s32.totalorder %s3308_s6, 1 }
   0xa   : > { %p197_p3 = scmp.ne.s32.totalorder %s4313_s27, %s4309_s26  ;;  %p198_p4 = scmp.eq.s32.totalorder %s3309_s30, 1 }
   0xb   : > { %s4403_s11 = scalar_select %p179_p1, %s4317_s28, %s181_s9  }
   0xc   : > { %p4405_p5 = por %p192_p2, %p191_p0  ;;  %p4409_p6 = por %p198_p4, %p197_p3 }
   0xd   : > { %p3312_p7 = scmp.ge.s32.totalorder %s4321_s29, 1  ;;  %p251_p8 = scmp.lt.s32.totalorder %s4321_s29, 3 }
   0xf   : > { %p252_p9 = pnand %p3312_p7, %p251_p8 }
  0x10   : > { %s4415_s14 = smul.u32 (!%p252_p9), 192, %s3308_s6  ;;  %vm522_vm0 = vcmask (!%p252_p9), 56320   ;;  %v4420_v1 = vld [vmem:[%s5479_s1] sm:$0xff] (!%p252_p9)  ;;  %v4323_v51 = vmov (!%p252_p9), 0   ;;  %vm1721_vm2 = vcmask (!%p252_p9), 261120   ;;  %s4326_s30 = smov (!%p252_p9), [#allocation3]  }
  0x11   : > { %255 = sbr.rel (%p252_p9) target bundleno = 964 (0x3c4), region = 48  ;;  %3622 = vmatprep.mubr.msk.f32.mxu0 (!%p252_p9), %vm522_vm0, %v4420_v1  ;;  %3662 = vmatprep.mubr.msk.f32.mxu1 (!%p252_p9), %vm522_vm0, %v4420_v1  ;;  %vm4435_vm1 = vmpackc.low (!%p252_p9), %vm522_vm0, %vm522_vm0  ;;  %s4263_s9 = sshll.u32 (!%p252_p9), %s4326_s30, 4  ;;  %s4264_s9 = int_to_ptr.vmem [resolvable:$false] %s4263_s9 }
  0x12   : > { %p292_p10 = scmp.lt.s32.totalorder (!%p252_p9), %s4415_s14, 374  ;;  %4257 = vset.pattern.permute.xlu0 (!%p252_p9), %v4323_v51  ;;  %4258 = vset.pattern.permute.xlu1 (!%p252_p9), %v4323_v51  ;;  %s5433_s24 = scalar_lea.hbm (!%p252_p9), %s5485_s7, %s4415_s14 }
  0x13   : > { %s4265_s10 = scalar_lea.vmem (!%p252_p9), %s4264_s9, 384 }
  0x18   : > { %s293_s17 = scalar_select %p292_p10, %s4415_s14, 374 }
  0x1a   : > { %s3313_s18 = sshll.u32 %s293_s17, 3  ;;  %s284_s17 = sand.u32 1, %s4313_s27  }
  0x1b   : > { %s4431_s21 = scalar_lea.vmem %s5478_s0, %s3313_s18  ;;  %s4214_s18 = smul.u32 12, %s284_s17 }
  0x1c   : > { %v322_v3 = vld [vmem:[%s4431_s21 + $0x80] sm:$0xff]  ;;  %v323_v4 = vld [vmem:[%s4431_s21 + $0x88] sm:$0xff]  ;;  %v324_v14 = vld [vmem:[%s4431_s21 + $0x90] sm:$0xff]  ;;  %s3236_s25 = scalar_lea.sflag [#allocation4], %s284_s17 }
  0x1d   : > { %v354_v5 = vld [vmem:[%s4431_s21 + $0x180] sm:$0xff]  ;;  %v3830_v6 = vpack.c.bf16 %v323_v4, %v322_v3  ;;  %v355_v7 = vld [vmem:[%s4431_s21 + $0x188] sm:$0xff]  ;;  %v325_v16 = vld [vmem:[%s4431_s21 + $0x98] sm:$0xff]  ;;  %s5385_s19 = scalar_lea.vmem [#allocation3], %s4214_s18 }
  0x1e   : > { %v306_v8 = vld [vmem:[%s4431_s21] sm:$0xff]  ;;  %v307_v9 = vld [vmem:[%s4431_s21 + $0x8] sm:$0xff]  ;;  %v3878_v10 = vpack.c.bf16 %v355_v7, %v354_v5  ;;  %v356_v17 = vld [vmem:[%s4431_s21 + $0x190] sm:$0xff]  ;;  %v3836_v19 = vpack.c.bf16 %v325_v16, %v324_v14  ;;  %s3250_s20 = sshll.u32 %s5385_s19, 4  ;;  %s5435_s20 = int_to_ptr.vmem [resolvable:$true] %s3250_s20 }
  0x1f   : > { %v3833_v11 = vpack.c.bf16 %v307_v9, %v306_v8  ;;  %v338_v12 = vld [vmem:[%s4431_s21 + $0x100] sm:$0xff]  ;;  %v339_v13 = vld [vmem:[%s4431_s21 + $0x108] sm:$0xff]  ;;  %3832 = vmatprep.subr.msk.bf16.mxu0 %vm4435_vm1, %v3830_v6  ;;  %v357_v18 = vld [vmem:[%s4431_s21 + $0x198] sm:$0xff]  ;;  %s4259_s6 = scalar_lea.vmem %s5435_s20, 192  ;;  %p4266_p0 = scmp.lt.s32.totalorder %s5435_s20, %s4264_s9 }
  0x20   : > { %v3881_v15 = vpack.c.bf16 %v339_v13, %v338_v12  ;;  %3880 = vmatprep.subr.msk.bf16.mxu1 %vm4435_vm1, %v3878_v10  ;;  %v3884_v20 = vpack.c.bf16 %v357_v18, %v356_v17  ;;  %v308_v21 = vld [vmem:[%s4431_s21 + $0x10] sm:$0xff]  ;;  %v309_v22 = vld [vmem:[%s4431_s21 + $0x18] sm:$0xff]  ;;  %v326_v25 = vld [vmem:[%s4431_s21 + $0xa0] sm:$0xff]  ;;  %p4260_p11 = scmp.ne.s32.totalorder %s5435_s20, %s4259_s6  ;;  %p4267_p1 = scmp.lt.s32.totalorder %s4265_s10, %s4259_s6 }
  0x21   : > { %3835 = vmatpush3.bf16.xpose.msk.msra.mxu0 %vm4435_vm1, %v3833_v11  ;;  %v340_v23 = vld [vmem:[%s4431_s21 + $0x110] sm:$0xff]  ;;  %v341_v24 = vld [vmem:[%s4431_s21 + $0x118] sm:$0xff]  ;;  %v327_v26 = vld [vmem:[%s4431_s21 + $0xa8] sm:$0xff]  ;;  %v3839_v29 = vpack.c.bf16 %v309_v22, %v308_v21 }
  0x22   : > { %3883 = vmatpush3.bf16.xpose.msk.msra.mxu1 %vm4435_vm1, %v3881_v15  ;;  %3838 = vmatprep.subr.msk.bf16.mxu0 %vm4435_vm1, %v3836_v19  ;;  %v358_v27 = vld [vmem:[%s4431_s21 + $0x1a0] sm:$0xff]  ;;  %v359_v28 = vld [vmem:[%s4431_s21 + $0x1a8] sm:$0xff]  ;;  %v3887_v30 = vpack.c.bf16 %v341_v24, %v340_v23  ;;  %v3842_v31 = vpack.c.bf16 %v327_v26, %v326_v25  ;;  %v328_v37 = vld [vmem:[%s4431_s21 + $0xb0] sm:$0xff]  ;;  %p4261_p12 = pnand %p4260_p11, %p4405_p5  ;;  %p4268_p2 = por %p4267_p1, %p4266_p0 }
  0x23   : > { %3886 = vmatprep.subr.msk.bf16.mxu1 %vm4435_vm1, %v3884_v20  ;;  %v3890_v32 = vpack.c.bf16 %v359_v28, %v358_v27  ;;  %v310_v33 = vld [vmem:[%s4431_s21 + $0x20] sm:$0xff]  ;;  %v311_v34 = vld [vmem:[%s4431_s21 + $0x28] sm:$0xff]  ;;  %v329_v38 = vld [vmem:[%s4431_s21 + $0xb8] sm:$0xff] }
  0x24   : > { %v342_v35 = vld [vmem:[%s4431_s21 + $0x120] sm:$0xff]  ;;  %v343_v36 = vld [vmem:[%s4431_s21 + $0x128] sm:$0xff]  ;;  %v360_v39 = vld [vmem:[%s4431_s21 + $0x1b0] sm:$0xff]  ;;  %v3845_v41 = vpack.c.bf16 %v311_v34, %v310_v33  ;;  %v3848_v43 = vpack.c.bf16 %v329_v38, %v328_v37  ;;  %p4262_p13 = pneg %p4261_p12 }
  0x25   : > { %v361_v40 = vld [vmem:[%s4431_s21 + $0x1b8] sm:$0xff]  ;;  %v3893_v42 = vpack.c.bf16 %v343_v36, %v342_v35  ;;  %v312_v45 = vld [vmem:[%s4431_s21 + $0x30] sm:$0xff]  ;;  %v330_v49 = vld [vmem:[%s4431_s21 + $0xc0] sm:$0xff] }
  0x26   : > { %v3896_v44 = vpack.c.bf16 %v361_v40, %v360_v39  ;;  %v313_v46 = vld [vmem:[%s4431_s21 + $0x38] sm:$0xff]  ;;  %v344_v47 = vld [vmem:[%s4431_s21 + $0x130] sm:$0xff]  ;;  %v331_v50 = vld [vmem:[%s4431_s21 + $0xc8] sm:$0xff]  ;;  %p4269_p3 = pnand %p4268_p2, %p4262_p13 }
  0x27   : > { %v345_v48 = vld [vmem:[%s4431_s21 + $0x138] sm:$0xff]  ;;  %v362_v52 = vld [vmem:[%s4431_s21 + $0x1c0] sm:$0xff]  ;;  %v363_v53 = vld [vmem:[%s4431_s21 + $0x1c8] sm:$0xff]  ;;  %v3851_v54 = vpack.c.bf16 %v313_v46, %v312_v45  ;;  %v3854_v56 = vpack.c.bf16 %v331_v50, %v330_v49 }
  0x28   : > { %v3899_v55 = vpack.c.bf16 %v345_v48, %v344_v47  ;;  %v3902_v57 = vpack.c.bf16 %v363_v53, %v362_v52  ;;  %v314_v58 = vld [vmem:[%s4431_s21 + $0x40] sm:$0xff]  ;;  %v315_v59 = vld [vmem:[%s4431_s21 + $0x48] sm:$0xff]  ;;  %v332_v62 = vld [vmem:[%s4431_s21 + $0xd0] sm:$0xff] }
  0x29   : > { %3841 = vmatpush3.bf16.xpose.msk.msra.mxu0 %vm4435_vm1, %v3839_v29  ;;  %v346_v60 = vld [vmem:[%s4431_s21 + $0x140] sm:$0xff]  ;;  %v347_v61 = vld [vmem:[%s4431_s21 + $0x148] sm:$0xff]  ;;  %v333_v63 = vld [vmem:[%s4431_s21 + $0xd8] sm:$0xff]  ;;  %v3857_v4 = vpack.c.bf16 %v315_v59, %v314_v58 }
  0x2a   : > { %3889 = vmatpush3.bf16.xpose.msk.msra.mxu1 %vm4435_vm1, %v3887_v30  ;;  %3844 = vmatprep.subr.msk.bf16.mxu0 %vm4435_vm1, %v3842_v31  ;;  %v364_v0 = vld [vmem:[%s4431_s21 + $0x1d0] sm:$0xff]  ;;  %v365_v3 = vld [vmem:[%s4431_s21 + $0x1d8] sm:$0xff]  ;;  %v3905_v5 = vpack.c.bf16 %v347_v61, %v346_v60  ;;  %v3860_v6 = vpack.c.bf16 %v333_v63, %v332_v62  ;;  %v334_v12 = vld [vmem:[%s4431_s21 + $0xe0] sm:$0xff] }
  0x2b   : > { %3892 = vmatprep.subr.msk.bf16.mxu1 %vm4435_vm1, %v3890_v32  ;;  %v3908_v7 = vpack.c.bf16 %v365_v3, %v364_v0  ;;  %v316_v8 = vld [vmem:[%s4431_s21 + $0x50] sm:$0xff]  ;;  %v317_v9 = vld [vmem:[%s4431_s21 + $0x58] sm:$0xff]  ;;  %v335_v13 = vld [vmem:[%s4431_s21 + $0xe8] sm:$0xff] }
  0x2c   : > { %v348_v10 = vld [vmem:[%s4431_s21 + $0x150] sm:$0xff]  ;;  %v349_v11 = vld [vmem:[%s4431_s21 + $0x158] sm:$0xff]  ;;  %v366_v14 = vld [vmem:[%s4431_s21 + $0x1e0] sm:$0xff]  ;;  %v3863_v16 = vpack.c.bf16 %v317_v9, %v316_v8  ;;  %v3866_v18 = vpack.c.bf16 %v335_v13, %v334_v12 }
  0x2d   : > { %v367_v15 = vld [vmem:[%s4431_s21 + $0x1e8] sm:$0xff]  ;;  %v3911_v17 = vpack.c.bf16 %v349_v11, %v348_v10  ;;  %v318_v20 = vld [vmem:[%s4431_s21 + $0x60] sm:$0xff]  ;;  %v336_v24 = vld [vmem:[%s4431_s21 + $0xf0] sm:$0xff] }
  0x2e   : > { %v3914_v19 = vpack.c.bf16 %v367_v15, %v366_v14  ;;  %v319_v21 = vld [vmem:[%s4431_s21 + $0x68] sm:$0xff]  ;;  %v350_v22 = vld [vmem:[%s4431_s21 + $0x160] sm:$0xff]  ;;  %v337_v25 = vld [vmem:[%s4431_s21 + $0xf8] sm:$0xff] }
  0x2f   : > { %v351_v23 = vld [vmem:[%s4431_s21 + $0x168] sm:$0xff]  ;;  %v368_v26 = vld [vmem:[%s4431_s21 + $0x1f0] sm:$0xff]  ;;  %v369_v27 = vld [vmem:[%s4431_s21 + $0x1f8] sm:$0xff]  ;;  %v3869_v28 = vpack.c.bf16 %v319_v21, %v318_v20  ;;  %v3872_v30 = vpack.c.bf16 %v337_v25, %v336_v24 }
  0x30   : > { %v3917_v29 = vpack.c.bf16 %v351_v23, %v350_v22  ;;  %v3920_v31 = vpack.c.bf16 %v369_v27, %v368_v26  ;;  %v498_v32 = vld [vmem:[%s5480_s2] sm:$0xff]  ;;  %v320_v33 = vld [vmem:[%s4431_s21 + $0x70] sm:$0xff]  ;;  %v499_v34 = vld [vmem:[%s5480_s2 + $0x8] sm:$0xff] }
  0x31   : > { %3847 = vmatpush3.bf16.xpose.msk.msra.mxu0 %vm4435_vm1, %v3845_v41  ;;  %504 = vperm.xlu0 %4257, %v498_v32   ;;  %v321_v35 = vld [vmem:[%s4431_s21 + $0x78] sm:$0xff]  ;;  %v352_v36 = vld [vmem:[%s4431_s21 + $0x170] sm:$0xff]  ;;  %v386_v38 = vld [vmem:[%s4431_s21 + $0x280] sm:$0xff] }
  0x32   : > { %3895 = vmatpush3.bf16.xpose.msk.msra.mxu1 %vm4435_vm1, %v3893_v42  ;;  %3850 = vmatprep.subr.msk.bf16.mxu0 %vm4435_vm1, %v3848_v43  ;;  %v353_v37 = vld [vmem:[%s4431_s21 + $0x178] sm:$0xff]  ;;  %v387_v39 = vld [vmem:[%s4431_s21 + $0x288] sm:$0xff]  ;;  %v500_v40 = vld [vmem:[%s5480_s2 + $0x10] sm:$0xff]  ;;  %v3875_v43 = vpack.c.bf16 %v321_v35, %v320_v33 }
  0x33   : > { %3898 = vmatprep.subr.msk.bf16.mxu1 %vm4435_vm1, %v3896_v44  ;;  %v418_v41 = vld [vmem:[%s4431_s21 + $0x380] sm:$0xff]  ;;  %v419_v42 = vld [vmem:[%s4431_s21 + $0x388] sm:$0xff]  ;;  %514 = vperm.xlu1 %4258, %v500_v40   ;;  %v501_v44 = vld [vmem:[%s5480_s2 + $0x18] sm:$0xff]  ;;  %v3923_v45 = vpack.c.bf16 %v353_v37, %v352_v36  ;;  %v3926_v46 = vpack.c.bf16 %v387_v39, %v386_v38 }
  0x34   : > { %v3974_v47 = vpack.c.bf16 %v419_v42, %v418_v41  ;;  %v370_v48 = vld [vmem:[%s4431_s21 + $0x200] sm:$0xff]  ;;  %v371_v49 = vld [vmem:[%s4431_s21 + $0x208] sm:$0xff]  ;;  %v388_v52 = vld [vmem:[%s4431_s21 + $0x290] sm:$0xff] }
  0x35   : > { %509 = vperm.xlu0 %4257, %v499_v34   ;;  %v402_v50 = vld [vmem:[%s4431_s21 + $0x300] sm:$0xff]  ;;  %v403_v51 = vld [vmem:[%s4431_s21 + $0x308] sm:$0xff]  ;;  %v389_v53 = vld [vmem:[%s4431_s21 + $0x298] sm:$0xff] }
  0x36   : > { %v4598_v58 = vld [vmem:[%s5479_s1 + $0x8] sm:$0xff]  ;;  %v3932_v59 = vpack.c.bf16 %v389_v53, %v388_v52  ;;  %v4613_v61 = vld [vmem:[%s5479_s1 + $0x10] sm:$0xff]  ;;  %v373_v63 = vld [vmem:[%s4431_s21 + $0x218] sm:$0xff] }
  0x37   : > { %519 = vperm.xlu1 %4258, %v501_v44   ;;  %v372_v62 = vld [vmem:[%s4431_s21 + $0x210] sm:$0xff]  ;;  %v405_v3 = vld [vmem:[%s4431_s21 + $0x318] sm:$0xff]  ;;  %v423_v8 = vld [vmem:[%s4431_s21 + $0x3a8] sm:$0xff] }
  0x38   : > { %v404_v0 = vld [vmem:[%s4431_s21 + $0x310] sm:$0xff]  ;;  %v4640_v10 = vld [vmem:[%s5479_s1 + $0x18] sm:$0xff]  ;;  %v374_v13 = vld [vmem:[%s4431_s21 + $0x220] sm:$0xff] }
  0x39   : > { %3853 = vmatpush3.bf16.xpose.msk.msra.mxu0 %vm4435_vm1, %v3851_v54  ;;  %v3929_v54 = vpack.c.bf16 %v371_v49, %v370_v48  ;;  %v3983_v9 = vpack.c.bf16 %v405_v3, %v404_v0  ;;  %v375_v14 = vld [vmem:[%s4431_s21 + $0x228] sm:$0xff]  ;;  %v406_v15 = vld [vmem:[%s4431_s21 + $0x320] sm:$0xff]  ;;  %v425_v20 = vld [vmem:[%s4431_s21 + $0x3b8] sm:$0xff] }
  0x3a   : > { %3901 = vmatpush3.bf16.xpose.msk.msra.mxu1 %vm4435_vm1, %v3899_v55  ;;  %3856 = vmatprep.subr.msk.bf16.mxu0 %vm4435_vm1, %v3854_v56  ;;  %v420_v55 = vld [vmem:[%s4431_s21 + $0x390] sm:$0xff]  ;;  %v421_v56 = vld [vmem:[%s4431_s21 + $0x398] sm:$0xff]  ;;  %v3941_v21 = vpack.c.bf16 %v375_v14, %v374_v13  ;;  %v1697_v22 = vld [vmem:[%s5482_s4] sm:$0xff] }
  0x3b   : > { %3904 = vmatprep.subr.msk.bf16.mxu1 %vm4435_vm1, %v3902_v57  ;;  %v3977_v57 = vpack.c.bf16 %v403_v51, %v402_v50  ;;  %v3980_v60 = vpack.c.bf16 %v421_v56, %v420_v55  ;;  %1703 = vperm.xlu0 %4257, %v1697_v22   ;;  %v1698_v25 = vld [vmem:[%s5482_s4 + $0x8] sm:$0xff]  ;;  %v1699_v27 = vld [vmem:[%s5482_s4 + $0x10] sm:$0xff]  ;;  %v409_v32 = vld [vmem:[%s4431_s21 + $0x338] sm:$0xff] }
  0x3c   : > { %1708 = vperm.xlu1 %4258, %v1698_v25   ;;  %v394_v33 = vld [vmem:[%s4431_s21 + $0x2c0] sm:$0xff]  ;;  %v395_v34 = vld [vmem:[%s4431_s21 + $0x2c8] sm:$0xff]  ;;  %v3561_v44 = vld [vmem:[%s5482_s4 + $0x38] sm:$0xff] }
  0x3d   : > { %v426_v35 = vld [vmem:[%s4431_s21 + $0x3c0] sm:$0xff]  ;;  %v427_v36 = vld [vmem:[%s4431_s21 + $0x3c8] sm:$0xff]  ;;  %v3950_v41 = vpack.c.bf16 %v395_v34, %v394_v33  ;;  %v396_v49 = vld [vmem:[%s4431_s21 + $0x2d0] sm:$0xff] }
  0x3e   : > { %v3558_v37 = vld [vmem:[%s5482_s4 + $0x20] sm:$0xff]  ;;  %v3559_v39 = vld [vmem:[%s5482_s4 + $0x28] sm:$0xff]  ;;  %v3998_v42 = vpack.c.bf16 %v427_v36, %v426_v35  ;;  %v397_v50 = vld [vmem:[%s4431_s21 + $0x2d8] sm:$0xff] }
  0x3f   : > { %1713 = vperm.xlu0 %4257, %v1699_v27   ;;  %v411_v48 = vld [vmem:[%s4431_s21 + $0x348] sm:$0xff]  ;;  %v428_v51 = vld [vmem:[%s4431_s21 + $0x3d0] sm:$0xff]  ;;  %v429_v52 = vld [vmem:[%s4431_s21 + $0x3d8] sm:$0xff] }
  0x40   : > { %v2940_v53 = vld [vmem:[%s5483_s5] sm:$0xff]  ;;  %v2941_v55 = vld [vmem:[%s5483_s5 + $0x8] sm:$0xff]  ;;  %v381_v0 = vld [vmem:[%s4431_s21 + $0x258] sm:$0xff] }
  0x41   : > { %3859 = vmatpush3.bf16.xpose.msk.msra.mxu0 %vm4435_vm1, %v3857_v4  ;;  %v390_v4 = vld [vmem:[%s4431_s21 + $0x2a0] sm:$0xff]  ;;  %v412_v3 = vld [vmem:[%s4431_s21 + $0x350] sm:$0xff]  ;;  %v433_v22 = vld [vmem:[%s4431_s21 + $0x3f8] sm:$0xff] }
  0x42   : > { %3907 = vmatpush3.bf16.xpose.msk.msra.mxu1 %vm4435_vm1, %v3905_v5  ;;  %3862 = vmatprep.subr.msk.bf16.mxu0 %vm4435_vm1, %v3860_v6  ;;  %v391_v5 = vld [vmem:[%s4431_s21 + $0x2a8] sm:$0xff]  ;;  %v3935_v6 = vpack.c.bf16 %v373_v63, %v372_v62  ;;  %v2943_v62 = vld [vmem:[%s5483_s5 + $0x18] sm:$0xff]  ;;  %v380_v63 = vld [vmem:[%s4431_s21 + $0x250] sm:$0xff] }
  0x43   : > { %3910 = vmatprep.subr.msk.bf16.mxu1 %vm4435_vm1, %v3908_v7  ;;  %v422_v7 = vld [vmem:[%s4431_s21 + $0x3a0] sm:$0xff]  ;;  %v3938_v11 = vpack.c.bf16 %v391_v5, %v390_v4  ;;  %2328 = vperm.xlu0 %4257, %v3558_v37   ;;  %v413_v4 = vld [vmem:[%s4431_s21 + $0x358] sm:$0xff]  ;;  %v384_v27 = vld [vmem:[%s4431_s21 + $0x270] sm:$0xff] }
  0x44   : > { %v3986_v12 = vpack.c.bf16 %v423_v8, %v422_v7  ;;  %v398_v5 = vld [vmem:[%s4431_s21 + $0x2e0] sm:$0xff]  ;;  %v431_v8 = vld [vmem:[%s4431_s21 + $0x3e8] sm:$0xff] }
  0x45   : > { %v430_v7 = vld [vmem:[%s4431_s21 + $0x3e0] sm:$0xff]  ;;  %v483_v34 = vld [vmem:[%s4431_s21 + $0x588] sm:$0xff] }
  0x46   : > { %v4010_v14 = vpack.c.bf16 %v431_v8, %v430_v7  ;;  %v482_v33 = vld [vmem:[%s4431_s21 + $0x580] sm:$0xff]  ;;  %v456_v7 = vld [vmem:[%s4431_s21 + $0x4b0] sm:$0xff]  ;;  %v457_v8 = vld [vmem:[%s4431_s21 + $0x4b8] sm:$0xff] }
  0x49   : > { %3865 = vmatpush3.bf16.xpose.msk.msra.mxu0 %vm4435_vm1, %v3863_v16  ;;  %v407_v16 = vld [vmem:[%s4431_s21 + $0x328] sm:$0xff] }
  0x4a   : > { %3913 = vmatpush3.bf16.xpose.msk.msra.mxu1 %vm4435_vm1, %v3911_v17  ;;  %3868 = vmatprep.subr.msk.bf16.mxu0 %vm4435_vm1, %v3866_v18  ;;  %v392_v17 = vld [vmem:[%s4431_s21 + $0x2b0] sm:$0xff]  ;;  %v393_v18 = vld [vmem:[%s4431_s21 + $0x2b8] sm:$0xff]  ;;  %v3989_v23 = vpack.c.bf16 %v407_v16, %v406_v15  ;;  %v382_v15 = vld [vmem:[%s4431_s21 + $0x260] sm:$0xff] }
  0x4b   : > { %3916 = vmatprep.subr.msk.bf16.mxu1 %vm4435_vm1, %v3914_v19  ;;  %v424_v19 = vld [vmem:[%s4431_s21 + $0x3b0] sm:$0xff]  ;;  %v3944_v24 = vpack.c.bf16 %v393_v18, %v392_v17  ;;  %v383_v16 = vld [vmem:[%s4431_s21 + $0x268] sm:$0xff]  ;;  %v414_v17 = vld [vmem:[%s4431_s21 + $0x360] sm:$0xff] }
  0x4c   : > { %v3992_v26 = vpack.c.bf16 %v425_v20, %v424_v19  ;;  %v415_v18 = vld [vmem:[%s4431_s21 + $0x368] sm:$0xff]  ;;  %v400_v19 = vld [vmem:[%s4431_s21 + $0x2f0] sm:$0xff]  ;;  %v401_v20 = vld [vmem:[%s4431_s21 + $0x2f8] sm:$0xff] }
  0x4d   : > { %v3968_v25 = vpack.c.bf16 %v401_v20, %v400_v19  ;;  %v473_v19 = vld [vmem:[%s4431_s21 + $0x538] sm:$0xff]  ;;  %v458_v20 = vld [vmem:[%s4431_s21 + $0x4c0] sm:$0xff] }
  0x51   : > { %3871 = vmatpush3.bf16.xpose.msk.msra.mxu0 %vm4435_vm1, %v3869_v28  ;;  %v1700_v28 = vld [vmem:[%s5482_s4 + $0x18] sm:$0xff] }
  0x52   : > { %3919 = vmatpush3.bf16.xpose.msk.msra.mxu1 %vm4435_vm1, %v3917_v29  ;;  %3874 = vmatprep.subr.msk.bf16.mxu0 %vm4435_vm1, %v3872_v30  ;;  %v376_v29 = vld [vmem:[%s4431_s21 + $0x230] sm:$0xff]  ;;  %v377_v30 = vld [vmem:[%s4431_s21 + $0x238] sm:$0xff] }
  0x53   : > { %3922 = vmatprep.subr.msk.bf16.mxu1 %vm4435_vm1, %v3920_v31  ;;  %v408_v31 = vld [vmem:[%s4431_s21 + $0x330] sm:$0xff]  ;;  %1718 = vperm.xlu1 %4258, %v1700_v28   ;;  %v3947_v38 = vpack.c.bf16 %v377_v30, %v376_v29  ;;  %v385_v28 = vld [vmem:[%s4431_s21 + $0x278] sm:$0xff] }
  0x54   : > { %v3995_v40 = vpack.c.bf16 %v409_v32, %v408_v31  ;;  %v416_v29 = vld [vmem:[%s4431_s21 + $0x370] sm:$0xff]  ;;  %v417_v30 = vld [vmem:[%s4431_s21 + $0x378] sm:$0xff]  ;;  %v450_v31 = vld [vmem:[%s4431_s21 + $0x480] sm:$0xff]  ;;  %v3971_v35 = vpack.c.bf16 %v385_v28, %v384_v27 }
  0x55   : > { %v451_v32 = vld [vmem:[%s4431_s21 + $0x488] sm:$0xff]  ;;  %v4019_v36 = vpack.c.bf16 %v417_v30, %v416_v29  ;;  %v442_v28 = vld [vmem:[%s4431_s21 + $0x440] sm:$0xff] }
  0x56   : > { %v4022_v37 = vpack.c.bf16 %v451_v32, %v450_v31  ;;  %v443_v29 = vld [vmem:[%s4431_s21 + $0x448] sm:$0xff]  ;;  %v474_v30 = vld [vmem:[%s4431_s21 + $0x540] sm:$0xff]  ;;  %v460_v32 = vld [vmem:[%s4431_s21 + $0x4d0] sm:$0xff] }
  0x57   : > { %2333 = vperm.xlu1 %4258, %v3559_v39   ;;  %v434_v39 = vld [vmem:[%s4431_s21 + $0x400] sm:$0xff]  ;;  %v475_v31 = vld [vmem:[%s4431_s21 + $0x548] sm:$0xff] }
  0x59   : > { %3877 = vmatpush3.bf16.xpose.msk.msra.mxu0 %vm4435_vm1, %v3875_v43  ;;  %v3560_v43 = vld [vmem:[%s5482_s4 + $0x30] sm:$0xff] }
  0x5a   : > { %3925 = vmatpush3.bf16.xpose.msk.msra.mxu1 %vm4435_vm1, %v3923_v45  ;;  %3928 = vmatprep.subr.msk.bf16.mxu0 %vm4435_vm1, %v3926_v46  ;;  %v378_v45 = vld [vmem:[%s4431_s21 + $0x240] sm:$0xff]  ;;  %v379_v46 = vld [vmem:[%s4431_s21 + $0x248] sm:$0xff] }
  0x5b   : > { %3976 = vmatprep.subr.msk.bf16.mxu1 %vm4435_vm1, %v3974_v47  ;;  %v410_v47 = vld [vmem:[%s4431_s21 + $0x340] sm:$0xff]  ;;  %2338 = vperm.xlu0 %4257, %v3560_v43   ;;  %v452_v43 = vld [vmem:[%s4431_s21 + $0x490] sm:$0xff] }
  0x5c   : > { %2343 = vperm.xlu1 %4258, %v3561_v44   ;;  %v4001_v56 = vpack.c.bf16 %v411_v48, %v410_v47  ;;  %v453_v44 = vld [vmem:[%s4431_s21 + $0x498] sm:$0xff] }
  0x5d   : > { %v485_v47 = vld [vmem:[%s4431_s21 + $0x598] sm:$0xff] }
  0x5f   : > { %2946 = vperm.xlu0 %4257, %v2940_v53   ;;  %v468_v53 = vld [vmem:[%s4431_s21 + $0x510] sm:$0xff] }
  0x60   : > { %3623 = vmatmul.mubr.msk.f32.vlgmr.msra.gmra.mrb[0].mxu0 %vm522_vm0, %v4420_v1  ;;  %2951 = vperm.xlu1 %4258, %v2941_v55   ;;  %v454_v55 = vld [vmem:[%s4431_s21 + $0x4a0] sm:$0xff] }
  0x61   : > { %3663 = vmatmul.mubr.msk.f32.vlgmr.msra.gmra.mrb[0].mxu1 %vm522_vm0, %v4420_v1  ;;  %3931 = vmatpush3.bf16.xpose.msk.msra.mxu0 %vm4435_vm1, %v3929_v54  ;;  %v3953_v54 = vpack.c.bf16 %v379_v46, %v378_v45  ;;  %v484_v46 = vld [vmem:[%s4431_s21 + $0x590] sm:$0xff] }
  0x62   : > { %3979 = vmatpush3.bf16.xpose.msk.msra.mxu1 %vm4435_vm1, %v3977_v57  ;;  %3624 = vmatprep.mubr.msk.f32.mxu0 %vm522_vm0, %v4598_v58  ;;  %v3956_v57 = vpack.c.bf16 %v397_v50, %v396_v49  ;;  %v4028_v49 = vpack.c.bf16 %v453_v44, %v452_v43  ;;  %v4076_v50 = vpack.c.bf16 %v485_v47, %v484_v46  ;;  %v477_v43 = vld [vmem:[%s4431_s21 + $0x558] sm:$0xff]  ;;  %v462_v44 = vld [vmem:[%s4431_s21 + $0x4e0] sm:$0xff]  ;;  %v495_v47 = vld [vmem:[%s4431_s21 + $0x5e8] sm:$0xff] }
  0x63   : > { %3664 = vmatprep.mubr.msk.f32.mxu1 %vm522_vm0, %v4598_v58  ;;  %3934 = vmatprep.subr.msk.bf16.mxu0 %vm4435_vm1, %v3932_v59  ;;  %v4004_v59 = vpack.c.bf16 %v429_v52, %v428_v51  ;;  %v436_v51 = vld [vmem:[%s4431_s21 + $0x410] sm:$0xff]  ;;  %v437_v52 = vld [vmem:[%s4431_s21 + $0x418] sm:$0xff]  ;;  %v494_v46 = vld [vmem:[%s4431_s21 + $0x5e0] sm:$0xff] }
  0x64   : > { %3625 = vmatmul.mubr.msk.f32.gmra.mrb[2].mxu0 %vm522_vm0, %v4598_v58  ;;  %3982 = vmatprep.subr.msk.bf16.mxu1 %vm4435_vm1, %v3980_v60  ;;  %v2942_v60 = vld [vmem:[%s5483_s5 + $0x10] sm:$0xff] }
  0x65   : > { %3665 = vmatmul.mubr.msk.f32.gmra.mrb[2].mxu1 %vm522_vm0, %v4598_v58  ;;  %3626 = vmatprep.mubr.msk.f32.mxu0 %vm522_vm0, %v4613_v61 }
  0x66   : > { %3666 = vmatprep.mubr.msk.f32.mxu1 %vm522_vm0, %v4613_v61  ;;  %2956 = vperm.xlu0 %4257, %v2942_v60   ;;  %v487_v60 = vld [vmem:[%s4431_s21 + $0x5a8] sm:$0xff] }
  0x67   : > { %2961 = vperm.xlu1 %4258, %v2943_v62  }
  0x68   : > { %3627 = vmatmul.mubr.msk.f32.gmra.mrb[4].mxu0 %vm522_vm0, %v4613_v61 }
  0x69   : > { %3667 = vmatmul.mubr.msk.f32.gmra.mrb[4].mxu1 %vm522_vm0, %v4613_v61  ;;  %3937 = vmatpush3.bf16.xpose.msk.msra.mxu0 %vm4435_vm1, %v3935_v6  ;;  %v399_v6 = vld [vmem:[%s4431_s21 + $0x2e8] sm:$0xff] }
  0x6a   : > { %3985 = vmatpush3.bf16.xpose.msk.msra.mxu1 %vm4435_vm1, %v3983_v9  ;;  %3628 = vmatprep.mubr.msk.f32.mxu0 %vm522_vm0, %v4640_v10  ;;  %v3120_v9 = vld [vmem:[#allocation2] sm:$0x1]  ;;  %v3962_v13 = vpack.c.bf16 %v399_v6, %v398_v5  ;;  %v471_v6 = vld [vmem:[%s4431_s21 + $0x528] sm:$0xff] }
  0x6b   : > { %3668 = vmatprep.mubr.msk.f32.mxu1 %vm522_vm0, %v4640_v10  ;;  %3940 = vmatprep.subr.msk.bf16.mxu0 %vm4435_vm1, %v3938_v11  ;;  %v3959_v11 = vpack.c.bf16 %v381_v0, %v380_v63  ;;  %v470_v5 = vld [vmem:[%s4431_s21 + $0x520] sm:$0xff] }
  0x6c   : > { %3629 = vmatmul.mubr.msk.f32.gmra.mrb[6].mxu0 %vm522_vm0, %v4640_v10  ;;  %3988 = vmatprep.subr.msk.bf16.mxu1 %vm4435_vm1, %v3986_v12  ;;  %v4007_v12 = vpack.c.bf16 %v413_v4, %v412_v3  ;;  %v438_v3 = vld [vmem:[%s4431_s21 + $0x420] sm:$0xff]  ;;  %v439_v4 = vld [vmem:[%s4431_s21 + $0x428] sm:$0xff] }
  0x6d   : > { %3669 = vmatmul.mubr.msk.f32.gmra.mrb[6].mxu1 %vm522_vm0, %v4640_v10  ;;  %3702 = vmatprep.mubr.msk.f32.mxu0 %vm522_vm0, %v4420_v1 }
  0x6e   : > { %3742 = vmatprep.mubr.msk.f32.mxu1 %vm522_vm0, %v4420_v1  ;;  %3123 = vperm.xlu0 %4257, %v3120_v9   ;;  %v488_v9 = vld [vmem:[%s4431_s21 + $0x5b0] sm:$0xff] }
  0x71   : > { %3943 = vmatpush3.bf16.xpose.msk.msra.mxu0 %vm4435_vm1, %v3941_v21  ;;  %v432_v21 = vld [vmem:[%s4431_s21 + $0x3f0] sm:$0xff] }
  0x72   : > { %3991 = vmatpush3.bf16.xpose.msk.msra.mxu1 %vm4435_vm1, %v3989_v23  ;;  %3946 = vmatprep.subr.msk.bf16.mxu0 %vm4435_vm1, %v3944_v24  ;;  %v3965_v23 = vpack.c.bf16 %v383_v16, %v382_v15  ;;  %v4013_v24 = vpack.c.bf16 %v415_v18, %v414_v17  ;;  %v440_v16 = vld [vmem:[%s4431_s21 + $0x430] sm:$0xff]  ;;  %v441_v17 = vld [vmem:[%s4431_s21 + $0x438] sm:$0xff] }
  0x73   : > { %3994 = vmatprep.subr.msk.bf16.mxu1 %vm4435_vm1, %v3992_v26  ;;  %v4016_v26 = vpack.c.bf16 %v433_v22, %v432_v21  ;;  %v472_v18 = vld [vmem:[%s4431_s21 + $0x530] sm:$0xff]  ;;  %v459_v21 = vld [vmem:[%s4431_s21 + $0x4c8] sm:$0xff]  ;;  %v490_v22 = vld [vmem:[%s4431_s21 + $0x5c0] sm:$0xff] }
  0x79   : > { %3949 = vmatpush3.bf16.xpose.msk.msra.mxu0 %vm4435_vm1, %v3947_v38  ;;  %v4070_v38 = vpack.c.bf16 %v483_v34, %v482_v33  ;;  %v461_v33 = vld [vmem:[%s4431_s21 + $0x4d8] sm:$0xff]  ;;  %v492_v34 = vld [vmem:[%s4431_s21 + $0x5d0] sm:$0xff] }
  0x7a   : > { %3997 = vmatpush3.bf16.xpose.msk.msra.mxu1 %vm4435_vm1, %v3995_v40  ;;  %3952 = vmatprep.subr.msk.bf16.mxu0 %vm4435_vm1, %v3950_v41  ;;  %v435_v40 = vld [vmem:[%s4431_s21 + $0x408] sm:$0xff]  ;;  %v466_v41 = vld [vmem:[%s4431_s21 + $0x500] sm:$0xff] }
  0x7b   : > { %4000 = vmatprep.subr.msk.bf16.mxu1 %vm4435_vm1, %v3998_v42  ;;  %v467_v42 = vld [vmem:[%s4431_s21 + $0x508] sm:$0xff]  ;;  %v4025_v45 = vpack.c.bf16 %v435_v40, %v434_v39  ;;  %v444_v40 = vld [vmem:[%s4431_s21 + $0x450] sm:$0xff] }
  0x7c   : > { %v4073_v48 = vpack.c.bf16 %v467_v42, %v466_v41  ;;  %v445_v41 = vld [vmem:[%s4431_s21 + $0x458] sm:$0xff]  ;;  %v476_v42 = vld [vmem:[%s4431_s21 + $0x550] sm:$0xff] }
  0x81   : > { %3955 = vmatpush3.bf16.xpose.msk.msra.mxu0 %vm4435_vm1, %v3953_v54  ;;  %v469_v54 = vld [vmem:[%s4431_s21 + $0x518] sm:$0xff] }
  0x82   : > { %4003 = vmatpush3.bf16.xpose.msk.msra.mxu1 %vm4435_vm1, %v4001_v56  ;;  %3958 = vmatprep.subr.msk.bf16.mxu0 %vm4435_vm1, %v3956_v57  ;;  %v455_v56 = vld [vmem:[%s4431_s21 + $0x4a8] sm:$0xff]  ;;  %v4031_v57 = vpack.c.bf16 %v437_v52, %v436_v51  ;;  %v4079_v62 = vpack.c.bf16 %v469_v54, %v468_v53  ;;  %v4106_v51 = vpack.c.bf16 %v495_v47, %v494_v46  ;;  %v446_v52 = vld [vmem:[%s4431_s21 + $0x460] sm:$0xff] }
  0x83   : > { %4006 = vmatprep.subr.msk.bf16.mxu1 %vm4435_vm1, %v4004_v59  ;;  %v486_v59 = vld [vmem:[%s4431_s21 + $0x5a0] sm:$0xff]  ;;  %v4034_v63 = vpack.c.bf16 %v455_v56, %v454_v55  ;;  %v447_v53 = vld [vmem:[%s4431_s21 + $0x468] sm:$0xff]  ;;  %v464_v56 = vld [vmem:[%s4431_s21 + $0x4f0] sm:$0xff] }
  0x84   : > { %v4082_v0 = vpack.c.bf16 %v487_v60, %v486_v59  ;;  %v478_v54 = vld [vmem:[%s4431_s21 + $0x560] sm:$0xff]  ;;  %v479_v55 = vld [vmem:[%s4431_s21 + $0x568] sm:$0xff]  ;;  %v496_v59 = vld [vmem:[%s4431_s21 + $0x5f0] sm:$0xff] }
  0x85   : > { %v497_v60 = vld [vmem:[%s4431_s21 + $0x5f8] sm:$0xff] }
  0x89   : > { %3961 = vmatpush3.bf16.xpose.msk.msra.mxu0 %vm4435_vm1, %v3959_v11  ;;  %v489_v11 = vld [vmem:[%s4431_s21 + $0x5b8] sm:$0xff] }
  0x8a   : > { %4009 = vmatpush3.bf16.xpose.msk.msra.mxu1 %vm4435_vm1, %v4007_v12  ;;  %3964 = vmatprep.subr.msk.bf16.mxu0 %vm4435_vm1, %v3962_v13  ;;  %v4037_v12 = vpack.c.bf16 %v439_v4, %v438_v3  ;;  %v4085_v13 = vpack.c.bf16 %v471_v6, %v470_v5  ;;  %v4088_v15 = vpack.c.bf16 %v489_v11, %v488_v9  ;;  %v448_v4 = vld [vmem:[%s4431_s21 + $0x470] sm:$0xff]  ;;  %v449_v5 = vld [vmem:[%s4431_s21 + $0x478] sm:$0xff] }
  0x8b   : > { %4012 = vmatprep.subr.msk.bf16.mxu1 %vm4435_vm1, %v4010_v14  ;;  %v4040_v14 = vpack.c.bf16 %v457_v8, %v456_v7  ;;  %v4112_v3 = vpack.c.bf16 %v497_v60, %v496_v59  ;;  %v480_v6 = vld [vmem:[%s4431_s21 + $0x570] sm:$0xff]  ;;  %v481_v7 = vld [vmem:[%s4431_s21 + $0x578] sm:$0xff]  ;;  %v4067_v8 = vpack.c.bf16 %v449_v5, %v448_v4 }
  0x8c   : > { %v4115_v9 = vpack.c.bf16 %v481_v7, %v480_v6  ;;  %v5007_v7 = vld [vmem:[%s5481_s3] sm:$0xff] }
  0x91   : > { %3967 = vmatpush3.bf16.xpose.msk.msra.mxu0 %vm4435_vm1, %v3965_v23  ;;  %v491_v23 = vld [vmem:[%s4431_s21 + $0x5c8] sm:$0xff] }
  0x92   : > { %4015 = vmatpush3.bf16.xpose.msk.msra.mxu1 %vm4435_vm1, %v4013_v24  ;;  %3970 = vmatprep.subr.msk.bf16.mxu0 %vm4435_vm1, %v3968_v25  ;;  %v4043_v24 = vpack.c.bf16 %v441_v17, %v440_v16  ;;  %v4091_v25 = vpack.c.bf16 %v473_v19, %v472_v18  ;;  %v4094_v27 = vpack.c.bf16 %v491_v23, %v490_v22 }
  0x93   : > { %4018 = vmatprep.subr.msk.bf16.mxu1 %vm4435_vm1, %v4016_v26  ;;  %v4046_v26 = vpack.c.bf16 %v459_v21, %v458_v20 }
  0x99   : > { %3973 = vmatpush3.bf16.xpose.msk.msra.mxu0 %vm4435_vm1, %v3971_v35  ;;  %v493_v35 = vld [vmem:[%s4431_s21 + $0x5d8] sm:$0xff] }
  0x9a   : > { %4021 = vmatpush3.bf16.xpose.msk.msra.mxu1 %vm4435_vm1, %v4019_v36  ;;  %4024 = vmatprep.subr.msk.bf16.mxu0 %vm4435_vm1, %v4022_v37  ;;  %v4049_v36 = vpack.c.bf16 %v443_v29, %v442_v28  ;;  %v4097_v37 = vpack.c.bf16 %v475_v31, %v474_v30  ;;  %v4100_v39 = vpack.c.bf16 %v493_v35, %v492_v34 }
  0x9b   : > { %4072 = vmatprep.subr.msk.bf16.mxu1 %vm4435_vm1, %v4070_v38  ;;  %v4052_v38 = vpack.c.bf16 %v461_v33, %v460_v32 }
  0xa0   : > { %3703 = vmatmul.mubr.msk.f32.vlgmr.msra.gmra.mrb[8].mxu0 %vm522_vm0, %v4420_v1 }
  0xa1   : > { %3743 = vmatmul.mubr.msk.f32.vlgmr.msra.gmra.mrb[8].mxu1 %vm522_vm0, %v4420_v1  ;;  %4027 = vmatpush3.bf16.xpose.msk.msra.mxu0 %vm4435_vm1, %v4025_v45  ;;  %v463_v45 = vld [vmem:[%s4431_s21 + $0x4e8] sm:$0xff] }
  0xa2   : > { %4075 = vmatpush3.bf16.xpose.msk.msra.mxu1 %vm4435_vm1, %v4073_v48  ;;  %3704 = vmatprep.mubr.msk.f32.mxu0 %vm522_vm0, %v4598_v58  ;;  %v4055_v48 = vpack.c.bf16 %v445_v41, %v444_v40 }
  0xa3   : > { %3744 = vmatprep.mubr.msk.f32.mxu1 %vm522_vm0, %v4598_v58  ;;  %4030 = vmatprep.subr.msk.bf16.mxu0 %vm4435_vm1, %v4028_v49  ;;  %v4103_v49 = vpack.c.bf16 %v477_v43, %v476_v42 }
  0xa4   : > { %3705 = vmatmul.mubr.msk.f32.gmra.mrb[10].mxu0 %vm522_vm0, %v4598_v58  ;;  %4078 = vmatprep.subr.msk.bf16.mxu1 %vm4435_vm1, %v4076_v50  ;;  %v4058_v50 = vpack.c.bf16 %v463_v45, %v462_v44 }
  0xa5   : > { %3745 = vmatmul.mubr.msk.f32.gmra.mrb[10].mxu1 %vm522_vm0, %v4598_v58  ;;  %3706 = vmatprep.mubr.msk.f32.mxu0 %vm522_vm0, %v4613_v61 }
  0xa6   : > { %3746 = vmatprep.mubr.msk.f32.mxu1 %vm522_vm0, %v4613_v61 }
  0xa8   : > { %3707 = vmatmul.mubr.msk.f32.gmra.mrb[12].mxu0 %vm522_vm0, %v4613_v61 }
  0xa9   : > { %3747 = vmatmul.mubr.msk.f32.gmra.mrb[12].mxu1 %vm522_vm0, %v4613_v61  ;;  %4033 = vmatpush3.bf16.xpose.msk.msra.mxu0 %vm4435_vm1, %v4031_v57  ;;  %v465_v57 = vld [vmem:[%s4431_s21 + $0x4f8] sm:$0xff] }
  0xaa   : > { %4081 = vmatpush3.bf16.xpose.msk.msra.mxu1 %vm4435_vm1, %v4079_v62  ;;  %3708 = vmatprep.mubr.msk.f32.mxu0 %vm522_vm0, %v4640_v10  ;;  %v4061_v62 = vpack.c.bf16 %v447_v53, %v446_v52 }
  0xab   : > { %3748 = vmatprep.mubr.msk.f32.mxu1 %vm522_vm0, %v4640_v10  ;;  %4036 = vmatprep.subr.msk.bf16.mxu0 %vm4435_vm1, %v4034_v63  ;;  %v4109_v63 = vpack.c.bf16 %v479_v55, %v478_v54 }
  0xac   : > { %3709 = vmatmul.mubr.msk.f32.gmra.mrb[14].mxu0 %vm522_vm0, %v4640_v10  ;;  %4084 = vmatprep.subr.msk.bf16.mxu1 %vm4435_vm1, %v4082_v0  ;;  %v4064_v0 = vpack.c.bf16 %v465_v57, %v464_v56 }
  0xad   : > { %3749 = vmatmul.mubr.msk.f32.gmra.mrb[14].mxu1 %vm522_vm0, %v4640_v10  ;;  %3782 = vmatprep.mubr.msk.f32.mxu0 %vm522_vm0, %v4420_v1 }
  0xae   : > { %3822 = vmatprep.mubr.msk.f32.mxu1 %vm522_vm0, %v4420_v1 }
  0xb0   : > { %v4980_v2 = vpop.permute.xlu0 %504 }
  0xb1   : > { %4039 = vmatpush3.bf16.xpose.msk.msra.mxu0 %vm4435_vm1, %v4037_v12 }
  0xb2   : > { %4087 = vmatpush3.bf16.xpose.msk.msra.mxu1 %vm4435_vm1, %v4085_v13  ;;  %4042 = vmatprep.subr.msk.bf16.mxu0 %vm4435_vm1, %v4040_v14  ;;  %v4987_v17 = vpop.permute.xlu1 %514 }
  0xb3   : > { %4090 = vmatprep.subr.msk.bf16.mxu1 %vm4435_vm1, %v4088_v15 }
  0xb4   : > { %v4982_v13 = vpop.permute.xlu0 %509 }
  0xb6   : > { %v4997_v44 = vpop.permute.xlu1 %519 }
  0xb9   : > { %4045 = vmatpush3.bf16.xpose.msk.msra.mxu0 %vm4435_vm1, %v4043_v24 }
  0xba   : > { %4093 = vmatpush3.bf16.xpose.msk.msra.mxu1 %vm4435_vm1, %v4091_v25  ;;  %4048 = vmatprep.subr.msk.bf16.mxu0 %vm4435_vm1, %v4046_v26 }
  0xbb   : > { %4096 = vmatprep.subr.msk.bf16.mxu1 %vm4435_vm1, %v4094_v27 }
  0xc1   : > { %4051 = vmatpush3.bf16.xpose.msk.msra.mxu0 %vm4435_vm1, %v4049_v36 }
  0xc2   : > { %4099 = vmatpush3.bf16.xpose.msk.msra.mxu1 %vm4435_vm1, %v4097_v37  ;;  %4054 = vmatprep.subr.msk.bf16.mxu0 %vm4435_vm1, %v4052_v38 }
  0xc3   : > { %4102 = vmatprep.subr.msk.bf16.mxu1 %vm4435_vm1, %v4100_v39 }
  0xc9   : > { %4057 = vmatpush3.bf16.xpose.msk.msra.mxu0 %vm4435_vm1, %v4055_v48 }
  0xca   : > { %4105 = vmatpush3.bf16.xpose.msk.msra.mxu1 %vm4435_vm1, %v4103_v49  ;;  %4060 = vmatprep.subr.msk.bf16.mxu0 %vm4435_vm1, %v4058_v50 }
  0xcb   : > { %4108 = vmatprep.subr.msk.bf16.mxu1 %vm4435_vm1, %v4106_v51 }
  0xd1   : > { %4063 = vmatpush3.bf16.xpose.msk.msra.mxu0 %vm4435_vm1, %v4061_v62 }
  0xd2   : > { %4111 = vmatpush3.bf16.xpose.msk.msra.mxu1 %vm4435_vm1, %v4109_v63  ;;  %4066 = vmatprep.subr.msk.bf16.mxu0 %vm4435_vm1, %v4064_v0 }
  0xd3   : > { %4114 = vmatprep.subr.msk.bf16.mxu1 %vm4435_vm1, %v4112_v3 }
  0xd9   : > { %4069 = vmatpush3.bf16.xpose.msk.msra.mxu0 %vm4435_vm1, %v4067_v8  ;;  %v5017_v8 = vld [vmem:[%s5481_s3 + $0x8] sm:$0xff] }
  0xda   : > { %4117 = vmatpush3.bf16.xpose.msk.msra.mxu1 %vm4435_vm1, %v4115_v9  ;;  %v5028_v9 = vld [vmem:[%s5481_s3 + $0x10] sm:$0xff] }
  0xe0   : > { %3783 = vmatmul.mubr.msk.f32.vlgmr.msra.gmra.mrb[16].mxu0 %vm522_vm0, %v4420_v1 }
  0xe1   : > { %3823 = vmatmul.mubr.msk.f32.vlgmr.msra.gmra.mrb[16].mxu1 %vm522_vm0, %v4420_v1  ;;  %3784 = vmatprep.mubr.msk.f32.mxu0 %vm522_vm0, %v4598_v58  ;;  %v4324_v1 = vmov 0.0  }
  0xe2   : > { %3824 = vmatprep.mubr.msk.f32.mxu1 %vm522_vm0, %v4598_v58 }
  0xe4   : > { %3785 = vmatmul.mubr.msk.f32.gmra.mrb[18].mxu0 %vm522_vm0, %v4598_v58 }
  0xe5   : > { %3825 = vmatmul.mubr.msk.f32.gmra.mrb[18].mxu1 %vm522_vm0, %v4598_v58  ;;  %3786 = vmatprep.mubr.msk.f32.mxu0 %vm522_vm0, %v4613_v61 }
  0xe6   : > { %3826 = vmatprep.mubr.msk.f32.mxu1 %vm522_vm0, %v4613_v61 }
  0xe8   : > { %3787 = vmatmul.mubr.msk.f32.gmra.mrb[20].mxu0 %vm522_vm0, %v4613_v61 }
  0xe9   : > { %3827 = vmatmul.mubr.msk.f32.gmra.mrb[20].mxu1 %vm522_vm0, %v4613_v61  ;;  %3788 = vmatprep.mubr.msk.f32.mxu0 %vm522_vm0, %v4640_v10 }
  0xea   : > { %3828 = vmatprep.mubr.msk.f32.mxu1 %vm522_vm0, %v4640_v10 }
  0xec   : > { %3789 = vmatmul.mubr.msk.f32.gmra.mrb[22].mxu0 %vm522_vm0, %v4640_v10 }
  0xed   : > { %3829 = vmatmul.mubr.msk.f32.gmra.mrb[22].mxu1 %vm522_vm0, %v4640_v10  ;;  %1798 = vmatprep.mubr.f32.mxu0 %v4324_v1 }
  0xee   : > { %1887 = vmatprep.mubr.f32.mxu1 %v4324_v1 }
 0x133   : > { %v1177_v58 = vpop.f32.mrb[0].mxu0 }
 0x134   : > { %v1266_v61 = vpop.f32.mrb[0].mxu1  ;;  %v1179_v11 = vpop.f32.mrb[1].mxu0  ;;  %v1178_v14 = vadd.f32 %v1177_v58, %v4980_v2  ;;  %v5039_v58 = vld [vmem:[%s5481_s3 + $0x18] sm:$0xff] }
 0x135   : > { %v1268_v12 = vpop.f32.mrb[1].mxu1  ;;  %v1267_v15 = vadd.f32 %v1266_v61, %v4980_v2  ;;  %v1180_v16 = vadd.f32 %v1179_v11, %v4980_v2 }
 0x136   : > { %v1269_v18 = vadd.f32 %v1268_v12, %v4980_v2  ;;  %v1645_v25 = vmax.f32 %v1178_v14, 0.0 }
 0x137   : > { %v1183_v10 = vpop.f32.mrb[2].mxu0  ;;  %v1647_v28 = vmax.f32 %v1267_v15, 0.0  ;;  %v1646_v29 = vmax.f32 %v1180_v16, 0.0 }
 0x138   : > { %v1184_v19 = vadd.f32 %v1183_v10, %v4982_v13  ;;  %v1272_v20 = vpop.f32.mrb[2].mxu1  ;;  %v1185_v21 = vpop.f32.mrb[3].mxu0  ;;  %v1648_v33 = vmax.f32 %v1269_v18, 0.0 }
 0x139   : > { %v1273_v22 = vadd.f32 %v1272_v20, %v4982_v13  ;;  %v1186_v23 = vadd.f32 %v1185_v21, %v4982_v13  ;;  %v1274_v24 = vpop.f32.mrb[3].mxu1 }
 0x13a   : > { %v1657_v26 = vmax.f32 %v1184_v19, 0.0  ;;  %v1275_v27 = vadd.f32 %v1274_v24, %v4982_v13 }
 0x13b   : > { %v1659_v30 = vmax.f32 %v1273_v22, 0.0  ;;  %v1658_v31 = vmax.f32 %v1186_v23, 0.0  ;;  %v1189_v32 = vpop.f32.mrb[4].mxu0 }
 0x13c   : > { %v4120_v34 = vpack.c.bf16 %v1657_v26, %v1645_v25  ;;  %v1660_v35 = vmax.f32 %v1275_v27, 0.0  ;;  %v1190_v36 = vadd.f32 %v1189_v32, %v4987_v17  ;;  %v1278_v37 = vpop.f32.mrb[4].mxu1  ;;  %v1191_v38 = vpop.f32.mrb[5].mxu0 }
 0x13d   : > { %v4128_v39 = vpack.c.bf16 %v1659_v30, %v1647_v28  ;;  %v4118_v40 = vpack.c.bf16 %v1658_v31, %v1646_v29  ;;  %v1279_v41 = vadd.f32 %v1278_v37, %v4987_v17  ;;  %v1192_v42 = vadd.f32 %v1191_v38, %v4987_v17  ;;  %v1280_v43 = vpop.f32.mrb[5].mxu1 }
 0x13e   : > { %v4126_v45 = vpack.c.bf16 %v1660_v35, %v1648_v33  ;;  %v1281_v46 = vadd.f32 %v1280_v43, %v4987_v17  ;;  %v1669_v48 = vmax.f32 %v1190_v36, 0.0 }
 0x13f   : > { %v1195_v47 = vpop.f32.mrb[6].mxu0  ;;  %4119 = vmatprep.subr.bf16.mxu0 %v4118_v40  ;;  %v1671_v52 = vmax.f32 %v1279_v41, 0.0  ;;  %v1670_v53 = vmax.f32 %v1192_v42, 0.0 }
 0x140   : > { %v1284_v49 = vpop.f32.mrb[6].mxu1  ;;  %4127 = vmatprep.subr.bf16.mxu1 %v4126_v45  ;;  %v1197_v50 = vpop.f32.mrb[7].mxu0  ;;  %4121 = vmatpush1.bf16.msra.mxu0 %v4120_v34  ;;  %v1196_v51 = vadd.f32 %v1195_v47, %v4997_v44  ;;  %v1672_v57 = vmax.f32 %v1281_v46, 0.0 }
 0x141   : > { %v1198_v54 = vadd.f32 %v1197_v50, %v4997_v44  ;;  %v1286_v55 = vpop.f32.mrb[7].mxu1  ;;  %4129 = vmatpush1.bf16.msra.mxu1 %v4128_v39  ;;  %v1285_v56 = vadd.f32 %v1284_v49, %v4997_v44 }
 0x142   : > { %v1287_v59 = vadd.f32 %v1286_v55, %v4997_v44  ;;  %v1681_v60 = vmax.f32 %v1196_v51, 0.0 }
 0x143   : > { %v1682_v62 = vmax.f32 %v1198_v54, 0.0  ;;  %v1683_v63 = vmax.f32 %v1285_v56, 0.0 }
 0x144   : > { %v1684_v0 = vmax.f32 %v1287_v59, 0.0  ;;  %v4124_v3 = vpack.c.bf16 %v1681_v60, %v1669_v48 }
 0x145   : > { %v4122_v4 = vpack.c.bf16 %v1682_v62, %v1670_v53  ;;  %v4132_v5 = vpack.c.bf16 %v1683_v63, %v1671_v52 }
 0x146   : > { %v4130_v6 = vpack.c.bf16 %v1684_v0, %v1672_v57 }
 0x147   : > { %4123 = vmatprep.subr.bf16.mxu0 %v4122_v4 }
 0x148   : > { %4131 = vmatprep.subr.bf16.mxu1 %v4130_v6  ;;  %4125 = vmatpush1.bf16.msra.mxu0 %v4124_v3 }
 0x149   : > { %4133 = vmatpush1.bf16.msra.mxu1 %v4132_v5 }
 0x14b   : > { %3530 = vmatmul.mubr.msk.f32.vlgmr.msra.gmra.mrb[24].mxu0 %vm1721_vm2, %v5007_v7 }
 0x14c   : > { %3534 = vmatmul.mubr.msk.f32.vlgmr.msra.gmra.mrb[24].mxu1 %vm1721_vm2, %v5007_v7  ;;  %1804 = vmatprep.mubr.f32.mxu0 %v4324_v1 }
 0x14d   : > { %1893 = vmatprep.mubr.f32.mxu1 %v4324_v1 }
 0x14f   : > { %3531 = vmatmul.mubr.msk.f32.gmra.mrb[26].mxu0 %vm1721_vm2, %v5017_v8 }
 0x150   : > { %3535 = vmatmul.mubr.msk.f32.gmra.mrb[26].mxu1 %vm1721_vm2, %v5017_v8  ;;  %1810 = vmatprep.mubr.f32.mxu0 %v4324_v1 }
 0x151   : > { %1899 = vmatprep.mubr.f32.mxu1 %v4324_v1 }
 0x153   : > { %3532 = vmatmul.mubr.msk.f32.gmra.mrb[28].mxu0 %vm1721_vm2, %v5028_v9 }
 0x154   : > { %3536 = vmatmul.mubr.msk.f32.gmra.mrb[28].mxu1 %vm1721_vm2, %v5028_v9  ;;  %1816 = vmatprep.mubr.f32.mxu0 %v4324_v1 }
 0x155   : > { %1905 = vmatprep.mubr.f32.mxu1 %v4324_v1 }
 0x157   : > { %3533 = vmatmul.mubr.msk.f32.gmra.mrb[30].mxu0 %vm1721_vm2, %v5039_v58 }
 0x158   : > { %3537 = vmatmul.mubr.msk.f32.gmra.mrb[30].mxu1 %vm1721_vm2, %v5039_v58  ;;  %1976 = vmatprep.mubr.f32.mxu0 %v4324_v1 }
 0x159   : > { %2065 = vmatprep.mubr.f32.mxu1 %v4324_v1 }
 0x173   : > { %v1355_v61 = vpop.f32.mrb[8].mxu0 }
 0x174   : > { %v1444_v11 = vpop.f32.mrb[8].mxu1  ;;  %v1357_v12 = vpop.f32.mrb[9].mxu0  ;;  %v1356_v15 = vadd.f32 %v1355_v61, %v4980_v2 }
 0x175   : > { %v1446_v14 = vpop.f32.mrb[9].mxu1  ;;  %v1445_v16 = vadd.f32 %v1444_v11, %v4980_v2  ;;  %v1358_v10 = vadd.f32 %v1357_v12, %v4980_v2 }
 0x176   : > { %v1447_v19 = vadd.f32 %v1446_v14, %v4980_v2  ;;  %v1649_v26 = vmax.f32 %v1356_v15, 0.0 }
 0x177   : > { %v1361_v18 = vpop.f32.mrb[10].mxu0  ;;  %v1651_v29 = vmax.f32 %v1445_v16, 0.0  ;;  %v1650_v30 = vmax.f32 %v1358_v10, 0.0 }
 0x178   : > { %v1362_v20 = vadd.f32 %v1361_v18, %v4982_v13  ;;  %v1450_v21 = vpop.f32.mrb[10].mxu1  ;;  %v1363_v22 = vpop.f32.mrb[11].mxu0  ;;  %v1652_v34 = vmax.f32 %v1447_v19, 0.0 }
 0x179   : > { %v1451_v23 = vadd.f32 %v1450_v21, %v4982_v13  ;;  %v1364_v24 = vadd.f32 %v1363_v22, %v4982_v13  ;;  %v1452_v25 = vpop.f32.mrb[11].mxu1 }
 0x17a   : > { %v1661_v27 = vmax.f32 %v1362_v20, 0.0  ;;  %v1453_v28 = vadd.f32 %v1452_v25, %v4982_v13 }
 0x17b   : > { %v1663_v31 = vmax.f32 %v1451_v23, 0.0  ;;  %v1662_v32 = vmax.f32 %v1364_v24, 0.0  ;;  %v1367_v33 = vpop.f32.mrb[12].mxu0 }
 0x17c   : > { %v4136_v35 = vpack.c.bf16 %v1661_v27, %v1649_v26  ;;  %v1664_v36 = vmax.f32 %v1453_v28, 0.0  ;;  %v1368_v37 = vadd.f32 %v1367_v33, %v4987_v17  ;;  %v1456_v38 = vpop.f32.mrb[12].mxu1  ;;  %v1369_v39 = vpop.f32.mrb[13].mxu0 }
 0x17d   : > { %v4144_v40 = vpack.c.bf16 %v1663_v31, %v1651_v29  ;;  %v4134_v41 = vpack.c.bf16 %v1662_v32, %v1650_v30  ;;  %v1457_v42 = vadd.f32 %v1456_v38, %v4987_v17  ;;  %v1370_v43 = vadd.f32 %v1369_v39, %v4987_v17  ;;  %v1458_v45 = vpop.f32.mrb[13].mxu1 }
 0x17e   : > { %v4142_v46 = vpack.c.bf16 %v1664_v36, %v1652_v34  ;;  %v1459_v47 = vadd.f32 %v1458_v45, %v4987_v17  ;;  %v1673_v49 = vmax.f32 %v1368_v37, 0.0 }
 0x17f   : > { %v1373_v48 = vpop.f32.mrb[14].mxu0  ;;  %4135 = vmatprep.subr.bf16.mxu0 %v4134_v41  ;;  %v1675_v53 = vmax.f32 %v1457_v42, 0.0  ;;  %v1674_v54 = vmax.f32 %v1370_v43, 0.0 }
 0x180   : > { %v1374_v50 = vadd.f32 %v1373_v48, %v4997_v44  ;;  %v1462_v51 = vpop.f32.mrb[14].mxu1  ;;  %4143 = vmatprep.subr.bf16.mxu1 %v4142_v46  ;;  %v1375_v52 = vpop.f32.mrb[15].mxu0  ;;  %4137 = vmatpush1.bf16.msra.mxu0 %v4136_v35  ;;  %v1676_v59 = vmax.f32 %v1459_v47, 0.0 }
 0x181   : > { %v1463_v55 = vadd.f32 %v1462_v51, %v4997_v44  ;;  %v1376_v56 = vadd.f32 %v1375_v52, %v4997_v44  ;;  %v1464_v57 = vpop.f32.mrb[15].mxu1  ;;  %4145 = vmatpush1.bf16.msra.mxu1 %v4144_v40 }
 0x182   : > { %v1685_v60 = vmax.f32 %v1374_v50, 0.0  ;;  %v1465_v62 = vadd.f32 %v1464_v57, %v4997_v44 }
 0x183   : > { %v1687_v63 = vmax.f32 %v1463_v55, 0.0  ;;  %v1686_v0 = vmax.f32 %v1376_v56, 0.0 }
 0x184   : > { %v4140_v3 = vpack.c.bf16 %v1685_v60, %v1673_v49  ;;  %v1688_v4 = vmax.f32 %v1465_v62, 0.0 }
 0x185   : > { %v4148_v5 = vpack.c.bf16 %v1687_v63, %v1675_v53  ;;  %v4138_v6 = vpack.c.bf16 %v1686_v0, %v1674_v54 }
 0x186   : > { %v4146_v61 = vpack.c.bf16 %v1688_v4, %v1676_v59 }
 0x187   : > { %4139 = vmatprep.subr.bf16.mxu0 %v4138_v6  ;;  %v5128_v6 = vpop.permute.xlu0 %1703 }
 0x188   : > { %4147 = vmatprep.subr.bf16.mxu1 %v4146_v61  ;;  %4141 = vmatpush1.bf16.msra.mxu0 %v4140_v3 }
 0x189   : > { %4149 = vmatpush1.bf16.msra.mxu1 %v4148_v5 }
 0x18b   : > { %3538 = vmatmul.mubr.msk.f32.vlgmr.msra.gmra.mrb[32].mxu0 %vm1721_vm2, %v5007_v7 }
 0x18c   : > { %3542 = vmatmul.mubr.msk.f32.vlgmr.msra.gmra.mrb[32].mxu1 %vm1721_vm2, %v5007_v7  ;;  %1982 = vmatprep.mubr.f32.mxu0 %v4324_v1 }
 0x18d   : > { %2071 = vmatprep.mubr.f32.mxu1 %v4324_v1 }
 0x18f   : > { %3539 = vmatmul.mubr.msk.f32.gmra.mrb[34].mxu0 %vm1721_vm2, %v5017_v8 }
 0x190   : > { %3543 = vmatmul.mubr.msk.f32.gmra.mrb[34].mxu1 %vm1721_vm2, %v5017_v8  ;;  %1988 = vmatprep.mubr.f32.mxu0 %v4324_v1 }
 0x191   : > { %2077 = vmatprep.mubr.f32.mxu1 %v4324_v1 }
 0x193   : > { %3540 = vmatmul.mubr.msk.f32.gmra.mrb[36].mxu0 %vm1721_vm2, %v5028_v9 }
 0x194   : > { %3544 = vmatmul.mubr.msk.f32.gmra.mrb[36].mxu1 %vm1721_vm2, %v5028_v9  ;;  %1994 = vmatprep.mubr.f32.mxu0 %v4324_v1 }
 0x195   : > { %2083 = vmatprep.mubr.f32.mxu1 %v4324_v1 }
 0x197   : > { %3541 = vmatmul.mubr.msk.f32.gmra.mrb[38].mxu0 %vm1721_vm2, %v5039_v58 }
 0x198   : > { %3545 = vmatmul.mubr.msk.f32.gmra.mrb[38].mxu1 %vm1721_vm2, %v5039_v58  ;;  %2154 = vmatprep.mubr.f32.mxu0 %v4324_v1 }
 0x199   : > { %2243 = vmatprep.mubr.f32.mxu1 %v4324_v1 }
 0x1b3   : > { %v1533_v11 = vpop.f32.mrb[16].mxu0 }
 0x1b4   : > { %v1622_v12 = vpop.f32.mrb[16].mxu1  ;;  %v1535_v14 = vpop.f32.mrb[17].mxu0  ;;  %v1534_v16 = vadd.f32 %v1533_v11, %v4980_v2 }
 0x1b5   : > { %v1624_v15 = vpop.f32.mrb[17].mxu1  ;;  %v1623_v10 = vadd.f32 %v1622_v12, %v4980_v2  ;;  %v1536_v18 = vadd.f32 %v1535_v14, %v4980_v2  ;;  %v5131_v11 = vpop.permute.xlu1 %1708 }
 0x1b6   : > { %v1625_v20 = vadd.f32 %v1624_v15, %v4980_v2  ;;  %v1653_v27 = vmax.f32 %v1534_v16, 0.0 }
 0x1b7   : > { %v1539_v19 = vpop.f32.mrb[18].mxu0  ;;  %v1655_v30 = vmax.f32 %v1623_v10, 0.0  ;;  %v1654_v31 = vmax.f32 %v1536_v18, 0.0 }
 0x1b8   : > { %v1540_v21 = vadd.f32 %v1539_v19, %v4982_v13  ;;  %v1628_v22 = vpop.f32.mrb[18].mxu1  ;;  %v1541_v23 = vpop.f32.mrb[19].mxu0  ;;  %v1656_v35 = vmax.f32 %v1625_v20, 0.0 }
 0x1b9   : > { %v1629_v24 = vadd.f32 %v1628_v22, %v4982_v13  ;;  %v1542_v25 = vadd.f32 %v1541_v23, %v4982_v13  ;;  %v1630_v26 = vpop.f32.mrb[19].mxu1 }
 0x1ba   : > { %v1665_v28 = vmax.f32 %v1540_v21, 0.0  ;;  %v1631_v29 = vadd.f32 %v1630_v26, %v4982_v13 }
 0x1bb   : > { %v1667_v32 = vmax.f32 %v1629_v24, 0.0  ;;  %v1666_v33 = vmax.f32 %v1542_v25, 0.0  ;;  %v1545_v34 = vpop.f32.mrb[20].mxu0 }
 0x1bc   : > { %v4152_v2 = vpack.c.bf16 %v1665_v28, %v1653_v27  ;;  %v1668_v36 = vmax.f32 %v1631_v29, 0.0  ;;  %v1634_v37 = vpop.f32.mrb[20].mxu1  ;;  %v1547_v38 = vpop.f32.mrb[21].mxu0  ;;  %v1546_v43 = vadd.f32 %v1545_v34, %v4987_v17 }
 0x1bd   : > { %v4160_v39 = vpack.c.bf16 %v1667_v32, %v1655_v30  ;;  %v4150_v40 = vpack.c.bf16 %v1666_v33, %v1654_v31  ;;  %v1636_v41 = vpop.f32.mrb[21].mxu1  ;;  %v1635_v45 = vadd.f32 %v1634_v37, %v4987_v17  ;;  %v1548_v13 = vadd.f32 %v1547_v38, %v4987_v17 }
 0x1be   : > { %v4158_v42 = vpack.c.bf16 %v1668_v36, %v1656_v35  ;;  %v1637_v47 = vadd.f32 %v1636_v41, %v4987_v17  ;;  %v1677_v54 = vmax.f32 %v1546_v43, 0.0  ;;  %v5140_v35 = vpop.permute.xlu0 %1713 }
 0x1bf   : > { %v1551_v46 = vpop.f32.mrb[22].mxu0  ;;  %4151 = vmatprep.subr.bf16.mxu0 %v4150_v40  ;;  %v1679_v57 = vmax.f32 %v1635_v45, 0.0  ;;  %v1678_v59 = vmax.f32 %v1548_v13, 0.0  ;;  %v5143_v40 = vpop.permute.xlu1 %1718 }
 0x1c0   : > { %v1552_v48 = vadd.f32 %v1551_v46, %v4997_v44  ;;  %v1640_v49 = vpop.f32.mrb[22].mxu1  ;;  %4159 = vmatprep.subr.bf16.mxu1 %v4158_v42  ;;  %v1553_v50 = vpop.f32.mrb[23].mxu0  ;;  %4153 = vmatpush1.bf16.msra.mxu0 %v4152_v2  ;;  %v1680_v62 = vmax.f32 %v1637_v47, 0.0 }
 0x1c1   : > { %v1641_v51 = vadd.f32 %v1640_v49, %v4997_v44  ;;  %v1554_v52 = vadd.f32 %v1553_v50, %v4997_v44  ;;  %v1642_v53 = vpop.f32.mrb[23].mxu1  ;;  %4161 = vmatpush1.bf16.msra.mxu1 %v4160_v39 }
 0x1c2   : > { %v1689_v55 = vmax.f32 %v1552_v48, 0.0  ;;  %v1643_v56 = vadd.f32 %v1642_v53, %v4997_v44 }
 0x1c3   : > { %v1691_v60 = vmax.f32 %v1641_v51, 0.0  ;;  %v1690_v17 = vmax.f32 %v1554_v52, 0.0 }
 0x1c4   : > { %v4156_v63 = vpack.c.bf16 %v1689_v55, %v1677_v54  ;;  %v1692_v0 = vmax.f32 %v1643_v56, 0.0 }
 0x1c5   : > { %v4164_v3 = vpack.c.bf16 %v1691_v60, %v1679_v57  ;;  %v4154_v4 = vpack.c.bf16 %v1690_v17, %v1678_v59 }
 0x1c6   : > { %v4162_v5 = vpack.c.bf16 %v1692_v0, %v1680_v62 }
 0x1c7   : > { %4155 = vmatprep.subr.bf16.mxu0 %v4154_v4  ;;  %v5165_v4 = vld [vmem:[%s5481_s3 + $0x28] sm:$0xff] }
 0x1c8   : > { %4163 = vmatprep.subr.bf16.mxu1 %v4162_v5  ;;  %4157 = vmatpush1.bf16.msra.mxu0 %v4156_v63  ;;  %v5176_v5 = vld [vmem:[%s5481_s3 + $0x30] sm:$0xff] }
 0x1c9   : > { %4165 = vmatpush1.bf16.msra.mxu1 %v4164_v3  ;;  %v5155_v3 = vld [vmem:[%s5481_s3 + $0x20] sm:$0xff] }
 0x1cb   : > { %3546 = vmatmul.mubr.msk.f32.vlgmr.msra.gmra.mrb[40].mxu0 %vm1721_vm2, %v5007_v7 }
 0x1cc   : > { %3550 = vmatmul.mubr.msk.f32.vlgmr.msra.gmra.mrb[40].mxu1 %vm1721_vm2, %v5007_v7  ;;  %2160 = vmatprep.mubr.f32.mxu0 %v4324_v1 }
 0x1cd   : > { %2249 = vmatprep.mubr.f32.mxu1 %v4324_v1 }
 0x1cf   : > { %3547 = vmatmul.mubr.msk.f32.gmra.mrb[42].mxu0 %vm1721_vm2, %v5017_v8 }
 0x1d0   : > { %3551 = vmatmul.mubr.msk.f32.gmra.mrb[42].mxu1 %vm1721_vm2, %v5017_v8  ;;  %2166 = vmatprep.mubr.f32.mxu0 %v4324_v1 }
 0x1d1   : > { %2255 = vmatprep.mubr.f32.mxu1 %v4324_v1 }
 0x1d3   : > { %3548 = vmatmul.mubr.msk.f32.gmra.mrb[44].mxu0 %vm1721_vm2, %v5028_v9 }
 0x1d4   : > { %3552 = vmatmul.mubr.msk.f32.gmra.mrb[44].mxu1 %vm1721_vm2, %v5028_v9  ;;  %2172 = vmatprep.mubr.f32.mxu0 %v4324_v1 }
 0x1d5   : > { %2261 = vmatprep.mubr.f32.mxu1 %v4324_v1 }
 0x1d7   : > { %3549 = vmatmul.mubr.msk.f32.gmra.mrb[46].mxu0 %vm1721_vm2, %v5039_v58 }
 0x1d8   : > { %3553 = vmatmul.mubr.msk.f32.gmra.mrb[46].mxu1 %vm1721_vm2, %v5039_v58  ;;  %2422 = vmatprep.mubr.f32.mxu0 %v4324_v1 }
 0x1d9   : > { %2511 = vmatprep.mubr.f32.mxu1 %v4324_v1 }
 0x21e   : > { %v1800_v44 = vpop.f32.mrb[24].mxu0 }
 0x21f   : > { %v1889_v7 = vpop.f32.mrb[24].mxu1  ;;  %v1802_v8 = vpop.f32.mrb[25].mxu0  ;;  %v1801_v61 = vadd.f32 %v1800_v44, %v5128_v6  ;;  %v5187_v44 = vld [vmem:[%s5481_s3 + $0x38] sm:$0xff] }
 0x220   : > { %v1891_v9 = vpop.f32.mrb[25].mxu1  ;;  %v1890_v12 = vadd.f32 %v1889_v7, %v5128_v6  ;;  %v1803_v14 = vadd.f32 %v1802_v8, %v5128_v6 }
 0x221   : > { %v1892_v58 = vadd.f32 %v1891_v9, %v5128_v6  ;;  %v2268_v22 = vmax.f32 %v1801_v61, 0.0 }
 0x222   : > { %v1806_v15 = vpop.f32.mrb[26].mxu0  ;;  %v2270_v25 = vmax.f32 %v1890_v12, 0.0  ;;  %v2269_v26 = vmax.f32 %v1803_v14, 0.0 }
 0x223   : > { %v1807_v16 = vadd.f32 %v1806_v15, %v5131_v11  ;;  %v1895_v10 = vpop.f32.mrb[26].mxu1  ;;  %v1808_v18 = vpop.f32.mrb[27].mxu0  ;;  %v2271_v30 = vmax.f32 %v1892_v58, 0.0 }
 0x224   : > { %v1896_v19 = vadd.f32 %v1895_v10, %v5131_v11  ;;  %v1809_v20 = vadd.f32 %v1808_v18, %v5131_v11  ;;  %v1897_v21 = vpop.f32.mrb[27].mxu1 }
 0x225   : > { %v2280_v23 = vmax.f32 %v1807_v16, 0.0  ;;  %v1898_v24 = vadd.f32 %v1897_v21, %v5131_v11 }
 0x226   : > { %v2282_v27 = vmax.f32 %v1896_v19, 0.0  ;;  %v2281_v28 = vmax.f32 %v1809_v20, 0.0  ;;  %v1812_v29 = vpop.f32.mrb[28].mxu0 }
 0x227   : > { %v4168_v31 = vpack.c.bf16 %v2280_v23, %v2268_v22  ;;  %v2283_v32 = vmax.f32 %v1898_v24, 0.0  ;;  %v1901_v33 = vpop.f32.mrb[28].mxu1  ;;  %v1814_v34 = vpop.f32.mrb[29].mxu0  ;;  %v1813_v39 = vadd.f32 %v1812_v29, %v5140_v35 }
 0x228   : > { %v4176_v2 = vpack.c.bf16 %v2282_v27, %v2270_v25  ;;  %v4166_v36 = vpack.c.bf16 %v2281_v28, %v2269_v26  ;;  %v1903_v37 = vpop.f32.mrb[29].mxu1  ;;  %v1902_v41 = vadd.f32 %v1901_v33, %v5140_v35  ;;  %v1815_v42 = vadd.f32 %v1814_v34, %v5140_v35 }
 0x229   : > { %v4174_v38 = vpack.c.bf16 %v2283_v32, %v2271_v30  ;;  %v1904_v45 = vadd.f32 %v1903_v37, %v5140_v35  ;;  %v2292_v51 = vmax.f32 %v1813_v39, 0.0 }
 0x22a   : > { %v1818_v43 = vpop.f32.mrb[30].mxu0  ;;  %4167 = vmatprep.subr.bf16.mxu0 %v4166_v36  ;;  %v2294_v54 = vmax.f32 %v1902_v41, 0.0  ;;  %v2293_v55 = vmax.f32 %v1815_v42, 0.0 }
 0x22b   : > { %v1819_v13 = vadd.f32 %v1818_v43, %v5143_v40  ;;  %v1907_v46 = vpop.f32.mrb[30].mxu1  ;;  %4175 = vmatprep.subr.bf16.mxu1 %v4174_v38  ;;  %v1820_v47 = vpop.f32.mrb[31].mxu0  ;;  %4169 = vmatpush1.bf16.msra.mxu0 %v4168_v31  ;;  %v2295_v59 = vmax.f32 %v1904_v45, 0.0 }
 0x22c   : > { %v1908_v48 = vadd.f32 %v1907_v46, %v5143_v40  ;;  %v1821_v49 = vadd.f32 %v1820_v47, %v5143_v40  ;;  %v1909_v50 = vpop.f32.mrb[31].mxu1  ;;  %4177 = vmatpush1.bf16.msra.mxu1 %v4176_v2 }
 0x22d   : > { %v2304_v52 = vmax.f32 %v1819_v13, 0.0  ;;  %v1910_v53 = vadd.f32 %v1909_v50, %v5143_v40 }
 0x22e   : > { %v2306_v56 = vmax.f32 %v1908_v48, 0.0  ;;  %v2305_v57 = vmax.f32 %v1821_v49, 0.0 }
 0x22f   : > { %v4172_v60 = vpack.c.bf16 %v2304_v52, %v2292_v51  ;;  %v2307_v17 = vmax.f32 %v1910_v53, 0.0 }
 0x230   : > { %v4180_v62 = vpack.c.bf16 %v2306_v56, %v2294_v54  ;;  %v4170_v63 = vpack.c.bf16 %v2305_v57, %v2293_v55 }
 0x231   : > { %v4178_v0 = vpack.c.bf16 %v2307_v17, %v2295_v59 }
 0x232   : > { %4171 = vmatprep.subr.bf16.mxu0 %v4170_v63 }
 0x233   : > { %4179 = vmatprep.subr.bf16.mxu1 %v4178_v0  ;;  %4173 = vmatpush1.bf16.msra.mxu0 %v4172_v60 }
 0x234   : > { %4181 = vmatpush1.bf16.msra.mxu1 %v4180_v62 }
 0x236   : > { %3562 = vmatmul.mubr.msk.f32.vlgmr.msra.gmra.mrb[48].mxu0 %vm1721_vm2, %v5155_v3 }
 0x237   : > { %3566 = vmatmul.mubr.msk.f32.vlgmr.msra.gmra.mrb[48].mxu1 %vm1721_vm2, %v5155_v3  ;;  %2428 = vmatprep.mubr.f32.mxu0 %v4324_v1 }
 0x238   : > { %2517 = vmatprep.mubr.f32.mxu1 %v4324_v1 }
 0x23a   : > { %3563 = vmatmul.mubr.msk.f32.gmra.mrb[50].mxu0 %vm1721_vm2, %v5165_v4 }
 0x23b   : > { %3567 = vmatmul.mubr.msk.f32.gmra.mrb[50].mxu1 %vm1721_vm2, %v5165_v4  ;;  %2434 = vmatprep.mubr.f32.mxu0 %v4324_v1 }
 0x23c   : > { %2523 = vmatprep.mubr.f32.mxu1 %v4324_v1 }
 0x23e   : > { %3564 = vmatmul.mubr.msk.f32.gmra.mrb[52].mxu0 %vm1721_vm2, %v5176_v5 }
 0x23f   : > { %3568 = vmatmul.mubr.msk.f32.gmra.mrb[52].mxu1 %vm1721_vm2, %v5176_v5  ;;  %2440 = vmatprep.mubr.f32.mxu0 %v4324_v1 }
 0x240   : > { %2529 = vmatprep.mubr.f32.mxu1 %v4324_v1 }
 0x242   : > { %3565 = vmatmul.mubr.msk.f32.gmra.mrb[54].mxu0 %vm1721_vm2, %v5187_v44 }
 0x243   : > { %3569 = vmatmul.mubr.msk.f32.gmra.mrb[54].mxu1 %vm1721_vm2, %v5187_v44  ;;  %2600 = vmatprep.mubr.f32.mxu0 %v4324_v1 }
 0x244   : > { %2689 = vmatprep.mubr.f32.mxu1 %v4324_v1 }
 0x25e   : > { %v1978_v7 = vpop.f32.mrb[32].mxu0 }
 0x25f   : > { %v2067_v8 = vpop.f32.mrb[32].mxu1  ;;  %v1980_v9 = vpop.f32.mrb[33].mxu0  ;;  %v1979_v12 = vadd.f32 %v1978_v7, %v5128_v6 }
 0x260   : > { %v2069_v61 = vpop.f32.mrb[33].mxu1  ;;  %v2068_v14 = vadd.f32 %v2067_v8, %v5128_v6  ;;  %v1981_v15 = vadd.f32 %v1980_v9, %v5128_v6 }
 0x261   : > { %v2070_v16 = vadd.f32 %v2069_v61, %v5128_v6  ;;  %v2272_v23 = vmax.f32 %v1979_v12, 0.0 }
 0x262   : > { %v1984_v58 = vpop.f32.mrb[34].mxu0  ;;  %v2274_v26 = vmax.f32 %v2068_v14, 0.0  ;;  %v2273_v27 = vmax.f32 %v1981_v15, 0.0 }
 0x263   : > { %v1985_v10 = vadd.f32 %v1984_v58, %v5131_v11  ;;  %v2073_v18 = vpop.f32.mrb[34].mxu1  ;;  %v1986_v19 = vpop.f32.mrb[35].mxu0  ;;  %v2275_v31 = vmax.f32 %v2070_v16, 0.0 }
 0x264   : > { %v2074_v20 = vadd.f32 %v2073_v18, %v5131_v11  ;;  %v1987_v21 = vadd.f32 %v1986_v19, %v5131_v11  ;;  %v2075_v22 = vpop.f32.mrb[35].mxu1 }
 0x265   : > { %v2284_v24 = vmax.f32 %v1985_v10, 0.0  ;;  %v2076_v25 = vadd.f32 %v2075_v22, %v5131_v11 }
 0x266   : > { %v2286_v28 = vmax.f32 %v2074_v20, 0.0  ;;  %v2285_v29 = vmax.f32 %v1987_v21, 0.0  ;;  %v1990_v30 = vpop.f32.mrb[36].mxu0 }
 0x267   : > { %v4184_v32 = vpack.c.bf16 %v2284_v24, %v2272_v23  ;;  %v2287_v33 = vmax.f32 %v2076_v25, 0.0  ;;  %v2079_v34 = vpop.f32.mrb[36].mxu1  ;;  %v1992_v2 = vpop.f32.mrb[37].mxu0  ;;  %v1991_v41 = vadd.f32 %v1990_v30, %v5140_v35 }
 0x268   : > { %v4192_v36 = vpack.c.bf16 %v2286_v28, %v2274_v26  ;;  %v4182_v37 = vpack.c.bf16 %v2285_v29, %v2273_v27  ;;  %v2081_v38 = vpop.f32.mrb[37].mxu1  ;;  %v2080_v42 = vadd.f32 %v2079_v34, %v5140_v35  ;;  %v1993_v43 = vadd.f32 %v1992_v2, %v5140_v35 }
 0x269   : > { %v4190_v39 = vpack.c.bf16 %v2287_v33, %v2275_v31  ;;  %v2082_v13 = vadd.f32 %v2081_v38, %v5140_v35  ;;  %v2296_v52 = vmax.f32 %v1991_v41, 0.0 }
 0x26a   : > { %v1996_v45 = vpop.f32.mrb[38].mxu0  ;;  %4183 = vmatprep.subr.bf16.mxu0 %v4182_v37  ;;  %v2298_v55 = vmax.f32 %v2080_v42, 0.0  ;;  %v2297_v56 = vmax.f32 %v1993_v43, 0.0 }
 0x26b   : > { %v1997_v46 = vadd.f32 %v1996_v45, %v5143_v40  ;;  %v2085_v47 = vpop.f32.mrb[38].mxu1  ;;  %4191 = vmatprep.subr.bf16.mxu1 %v4190_v39  ;;  %v1998_v48 = vpop.f32.mrb[39].mxu0  ;;  %4185 = vmatpush1.bf16.msra.mxu0 %v4184_v32  ;;  %v2299_v60 = vmax.f32 %v2082_v13, 0.0 }
 0x26c   : > { %v2086_v49 = vadd.f32 %v2085_v47, %v5143_v40  ;;  %v1999_v50 = vadd.f32 %v1998_v48, %v5143_v40  ;;  %v2087_v51 = vpop.f32.mrb[39].mxu1  ;;  %4193 = vmatpush1.bf16.msra.mxu1 %v4192_v36 }
 0x26d   : > { %v2308_v53 = vmax.f32 %v1997_v46, 0.0  ;;  %v2088_v54 = vadd.f32 %v2087_v51, %v5143_v40 }
 0x26e   : > { %v2310_v57 = vmax.f32 %v2086_v49, 0.0  ;;  %v2309_v59 = vmax.f32 %v1999_v50, 0.0 }
 0x26f   : > { %v4188_v17 = vpack.c.bf16 %v2308_v53, %v2296_v52  ;;  %v2311_v62 = vmax.f32 %v2088_v54, 0.0 }
 0x270   : > { %v4196_v63 = vpack.c.bf16 %v2310_v57, %v2298_v55  ;;  %v4186_v0 = vpack.c.bf16 %v2309_v59, %v2297_v56 }
 0x271   : > { %v4194_v7 = vpack.c.bf16 %v2311_v62, %v2299_v60 }
 0x272   : > { %4187 = vmatprep.subr.bf16.mxu0 %v4186_v0 }
 0x273   : > { %4195 = vmatprep.subr.bf16.mxu1 %v4194_v7  ;;  %4189 = vmatpush1.bf16.msra.mxu0 %v4188_v17 }
 0x274   : > { %4197 = vmatpush1.bf16.msra.mxu1 %v4196_v63 }
 0x276   : > { %3570 = vmatmul.mubr.msk.f32.vlgmr.msra.gmra.mrb[56].mxu0 %vm1721_vm2, %v5155_v3 }
 0x277   : > { %3574 = vmatmul.mubr.msk.f32.vlgmr.msra.gmra.mrb[56].mxu1 %vm1721_vm2, %v5155_v3  ;;  %2606 = vmatprep.mubr.f32.mxu0 %v4324_v1 }
 0x278   : > { %2695 = vmatprep.mubr.f32.mxu1 %v4324_v1 }
 0x27a   : > { %3571 = vmatmul.mubr.msk.f32.gmra.mrb[58].mxu0 %vm1721_vm2, %v5165_v4 }
 0x27b   : > { %3575 = vmatmul.mubr.msk.f32.gmra.mrb[58].mxu1 %vm1721_vm2, %v5165_v4  ;;  %2612 = vmatprep.mubr.f32.mxu0 %v4324_v1 }
 0x27c   : > { %2701 = vmatprep.mubr.f32.mxu1 %v4324_v1 }
 0x27e   : > { %3572 = vmatmul.mubr.msk.f32.gmra.mrb[60].mxu0 %vm1721_vm2, %v5176_v5 }
 0x27f   : > { %3576 = vmatmul.mubr.msk.f32.gmra.mrb[60].mxu1 %vm1721_vm2, %v5176_v5  ;;  %2618 = vmatprep.mubr.f32.mxu0 %v4324_v1 }
 0x280   : > { %2707 = vmatprep.mubr.f32.mxu1 %v4324_v1 }
 0x282   : > { %3573 = vmatmul.mubr.msk.f32.gmra.mrb[62].mxu0 %vm1721_vm2, %v5187_v44 }
 0x283   : > { %3577 = vmatmul.mubr.msk.f32.gmra.mrb[62].mxu1 %vm1721_vm2, %v5187_v44  ;;  %2778 = vmatprep.mubr.f32.mxu0 %v4324_v1 }
 0x284   : > { %2867 = vmatprep.mubr.f32.mxu1 %v4324_v1 }
 0x29e   : > { %v2156_v8 = vpop.f32.mrb[40].mxu0 }
 0x29f   : > { %v2245_v9 = vpop.f32.mrb[40].mxu1  ;;  %v2158_v61 = vpop.f32.mrb[41].mxu0  ;;  %v2157_v14 = vadd.f32 %v2156_v8, %v5128_v6 }
 0x2a0   : > { %v2247_v12 = vpop.f32.mrb[41].mxu1  ;;  %v2246_v15 = vadd.f32 %v2245_v9, %v5128_v6  ;;  %v2159_v58 = vadd.f32 %v2158_v61, %v5128_v6 }
 0x2a1   : > { %v2248_v10 = vadd.f32 %v2247_v12, %v5128_v6  ;;  %v2276_v24 = vmax.f32 %v2157_v14, 0.0 }
 0x2a2   : > { %v2162_v16 = vpop.f32.mrb[42].mxu0  ;;  %v2278_v27 = vmax.f32 %v2246_v15, 0.0  ;;  %v2277_v28 = vmax.f32 %v2159_v58, 0.0 }
 0x2a3   : > { %v2163_v18 = vadd.f32 %v2162_v16, %v5131_v11  ;;  %v2251_v19 = vpop.f32.mrb[42].mxu1  ;;  %v2164_v20 = vpop.f32.mrb[43].mxu0  ;;  %v2279_v32 = vmax.f32 %v2248_v10, 0.0 }
 0x2a4   : > { %v2252_v21 = vadd.f32 %v2251_v19, %v5131_v11  ;;  %v2165_v22 = vadd.f32 %v2164_v20, %v5131_v11  ;;  %v2253_v23 = vpop.f32.mrb[43].mxu1 }
 0x2a5   : > { %v2288_v25 = vmax.f32 %v2163_v18, 0.0  ;;  %v2254_v26 = vadd.f32 %v2253_v23, %v5131_v11 }
 0x2a6   : > { %v2290_v29 = vmax.f32 %v2252_v21, 0.0  ;;  %v2289_v30 = vmax.f32 %v2165_v22, 0.0  ;;  %v2168_v31 = vpop.f32.mrb[44].mxu0 }
 0x2a7   : > { %v4200_v6 = vpack.c.bf16 %v2288_v25, %v2276_v24  ;;  %v2291_v33 = vmax.f32 %v2254_v26, 0.0  ;;  %v2257_v34 = vpop.f32.mrb[44].mxu1  ;;  %v2170_v2 = vpop.f32.mrb[45].mxu0  ;;  %v2169_v41 = vadd.f32 %v2168_v31, %v5140_v35 }
 0x2a8   : > { %v4208_v36 = vpack.c.bf16 %v2290_v29, %v2278_v27  ;;  %v4198_v37 = vpack.c.bf16 %v2289_v30, %v2277_v28  ;;  %v2259_v38 = vpop.f32.mrb[45].mxu1  ;;  %v2258_v42 = vadd.f32 %v2257_v34, %v5140_v35  ;;  %v2171_v11 = vadd.f32 %v2170_v2, %v5140_v35 }
 0x2a9   : > { %v4206_v39 = vpack.c.bf16 %v2291_v33, %v2279_v32  ;;  %v2260_v45 = vadd.f32 %v2259_v38, %v5140_v35  ;;  %v2300_v51 = vmax.f32 %v2169_v41, 0.0 }
 0x2aa   : > { %v2174_v43 = vpop.f32.mrb[46].mxu0  ;;  %4199 = vmatprep.subr.bf16.mxu0 %v4198_v37  ;;  %v2302_v54 = vmax.f32 %v2258_v42, 0.0  ;;  %v2301_v55 = vmax.f32 %v2171_v11, 0.0 }
 0x2ab   : > { %v2175_v13 = vadd.f32 %v2174_v43, %v5143_v40  ;;  %v2263_v46 = vpop.f32.mrb[46].mxu1  ;;  %4207 = vmatprep.subr.bf16.mxu1 %v4206_v39  ;;  %v2176_v47 = vpop.f32.mrb[47].mxu0  ;;  %4201 = vmatpush1.bf16.msra.mxu0 %v4200_v6  ;;  %v2303_v57 = vmax.f32 %v2260_v45, 0.0 }
 0x2ac   : > { %v2264_v48 = vadd.f32 %v2263_v46, %v5143_v40  ;;  %v2177_v49 = vadd.f32 %v2176_v47, %v5143_v40  ;;  %v2265_v50 = vpop.f32.mrb[47].mxu1  ;;  %4209 = vmatpush1.bf16.msra.mxu1 %v4208_v36 }
 0x2ad   : > { %v2312_v52 = vmax.f32 %v2175_v13, 0.0  ;;  %v2266_v53 = vadd.f32 %v2265_v50, %v5143_v40  ;;  %v5274_v40 = vpop.permute.xlu0 %2328 }
 0x2ae   : > { %v2314_v56 = vmax.f32 %v2264_v48, 0.0  ;;  %v2313_v35 = vmax.f32 %v2177_v49, 0.0 }
 0x2af   : > { %v4204_v59 = vpack.c.bf16 %v2312_v52, %v2300_v51  ;;  %v2315_v60 = vmax.f32 %v2266_v53, 0.0 }
 0x2b0   : > { %v4212_v17 = vpack.c.bf16 %v2314_v56, %v2302_v54  ;;  %v4202_v62 = vpack.c.bf16 %v2313_v35, %v2301_v55 }
 0x2b1   : > { %v4210_v63 = vpack.c.bf16 %v2315_v60, %v2303_v57 }
 0x2b2   : > { %4203 = vmatprep.subr.bf16.mxu0 %v4202_v62 }
 0x2b3   : > { %4211 = vmatprep.subr.bf16.mxu1 %v4210_v63  ;;  %4205 = vmatpush1.bf16.msra.mxu0 %v4204_v59 }
 0x2b4   : > { %4213 = vmatpush1.bf16.msra.mxu1 %v4212_v17 }
 0x2b6   : > { %3578 = vmatmul.mubr.msk.f32.vlgmr.msra.gmra.mrb[64].mxu0 %vm1721_vm2, %v5155_v3 }
 0x2b7   : > { %3582 = vmatmul.mubr.msk.f32.vlgmr.msra.gmra.mrb[64].mxu1 %vm1721_vm2, %v5155_v3  ;;  %2784 = vmatprep.mubr.f32.mxu0 %v4324_v1  ;;  %v5276_v3 = vpop.permute.xlu1 %2333 }
 0x2b8   : > { %2873 = vmatprep.mubr.f32.mxu1 %v4324_v1 }
 0x2ba   : > { %3579 = vmatmul.mubr.msk.f32.gmra.mrb[66].mxu0 %vm1721_vm2, %v5165_v4 }
 0x2bb   : > { %3583 = vmatmul.mubr.msk.f32.gmra.mrb[66].mxu1 %vm1721_vm2, %v5165_v4  ;;  %2790 = vmatprep.mubr.f32.mxu0 %v4324_v1  ;;  %v5278_v4 = vpop.permute.xlu0 %2338  ;;  %v5281_v9 = vpop.permute.xlu1 %2343 }
 0x2bc   : > { %2879 = vmatprep.mubr.f32.mxu1 %v4324_v1 }
 0x2be   : > { %3580 = vmatmul.mubr.msk.f32.gmra.mrb[68].mxu0 %vm1721_vm2, %v5176_v5 }
 0x2bf   : > { %3584 = vmatmul.mubr.msk.f32.gmra.mrb[68].mxu1 %vm1721_vm2, %v5176_v5  ;;  %2796 = vmatprep.mubr.f32.mxu0 %v4324_v1  ;;  %v5287_v21 = vpop.permute.xlu0 %2946  ;;  %v5293_v28 = vpop.permute.xlu1 %2951 }
 0x2c0   : > { %2885 = vmatprep.mubr.f32.mxu1 %v4324_v1 }
 0x2c2   : > { %3581 = vmatmul.mubr.msk.f32.gmra.mrb[70].mxu0 %vm1721_vm2, %v5187_v44 }
 0x2c3   : > { %3585 = vmatmul.mubr.msk.f32.gmra.mrb[70].mxu1 %vm1721_vm2, %v5187_v44  ;;  %v5306_v48 = vpop.permute.xlu0 %2956 }
 0x309   : > { %v2424_v0 = vpop.f32.mrb[48].mxu0 }
 0x30a   : > { %v2425_v7 = vadd.f32 %v2424_v0, %v5274_v40  ;;  %v2513_v5 = vpop.f32.mrb[48].mxu1  ;;  %v2426_v8 = vpop.f32.mrb[49].mxu0 }
 0x30b   : > { %v2514_v1 = vadd.f32 %v2513_v5, %v5274_v40  ;;  %v2427_v61 = vadd.f32 %v2426_v8, %v5274_v40  ;;  %v2515_v12 = vpop.f32.mrb[49].mxu1 }
 0x30c   : > { %v2892_v14 = vmax.f32 %v2425_v7, 0.0  ;;  %v2516_v44 = vadd.f32 %v2515_v12, %v5274_v40 }
 0x30d   : > { %v2894_v15 = vmax.f32 %v2514_v1, 0.0  ;;  %v2893_v58 = vmax.f32 %v2427_v61, 0.0  ;;  %v2430_v16 = vpop.f32.mrb[50].mxu0  ;;  %v5316_v61 = vpop.permute.xlu1 %2961 }
 0x30e   : > { %v2895_v10 = vmax.f32 %v2516_v44, 0.0  ;;  %v2431_v18 = vadd.f32 %v2430_v16, %v5276_v3  ;;  %v2519_v19 = vpop.f32.mrb[50].mxu1  ;;  %v2432_v20 = vpop.f32.mrb[51].mxu0  ;;  %v2964_v25 = vmul.f32 %v5287_v21, %v2892_v14 }
 0x30f   : > { %v2520_v22 = vadd.f32 %v2519_v19, %v5276_v3  ;;  %v2433_v23 = vadd.f32 %v2432_v20, %v5276_v3  ;;  %v2521_v24 = vpop.f32.mrb[51].mxu1  ;;  %v2966_v29 = vmul.f32 %v5287_v21, %v2894_v15  ;;  %v2965_v30 = vmul.f32 %v5287_v21, %v2893_v58 }
 0x310   : > { %v2904_v26 = vmax.f32 %v2431_v18, 0.0  ;;  %v2522_v27 = vadd.f32 %v2521_v24, %v5276_v3  ;;  %v2967_v33 = vmul.f32 %v5287_v21, %v2895_v10  ;;  %v3126_v20 = vlaneseq }
 0x311   : > { %v2906_v31 = vmax.f32 %v2520_v22, 0.0  ;;  %v2905_v32 = vmax.f32 %v2433_v23, 0.0  ;;  %v2436_v6 = vpop.f32.mrb[52].mxu0 }
 0x312   : > { %v2976_v34 = vmul.f32 %v5293_v28, %v2904_v26  ;;  %v2907_v2 = vmax.f32 %v2522_v27, 0.0  ;;  %v2437_v36 = vadd.f32 %v2436_v6, %v5278_v4  ;;  %v2525_v37 = vpop.f32.mrb[52].mxu1  ;;  %v2438_v38 = vpop.f32.mrb[53].mxu0  ;;  %vm3232_vm3 = vcmp.lt.s32.totalorder %v3126_v20, 512 }
 0x313   : > { %v2978_v39 = vmul.f32 %v5293_v28, %v2906_v31  ;;  %v2977_v41 = vmul.f32 %v5293_v28, %v2905_v32  ;;  %v2526_v42 = vadd.f32 %v2525_v37, %v5278_v4  ;;  %v2439_v11 = vadd.f32 %v2438_v38, %v5278_v4  ;;  %v2527_v43 = vpop.f32.mrb[53].mxu1 }
 0x314   : > { %v3012_v45 = vadd.f32 %v2976_v34, %v2964_v25  ;;  %v2979_v13 = vmul.f32 %v5293_v28, %v2907_v2  ;;  %v2916_v46 = vmax.f32 %v2437_v36, 0.0  ;;  %v2528_v47 = vadd.f32 %v2527_v43, %v5278_v4 }
 0x315   : > { %v3030_v49 = vadd.f32 %v2978_v39, %v2966_v29  ;;  %v3021_v50 = vadd.f32 %v2977_v41, %v2965_v30  ;;  %v2918_v51 = vmax.f32 %v2526_v42, 0.0  ;;  %v2917_v52 = vmax.f32 %v2439_v11, 0.0  ;;  %v2442_v53 = vpop.f32.mrb[54].mxu0 }
 0x316   : > { %v3039_v54 = vadd.f32 %v2979_v13, %v2967_v33  ;;  %v2988_v55 = vmul.f32 %v5306_v48, %v2916_v46  ;;  %v2919_v56 = vmax.f32 %v2528_v47, 0.0  ;;  %v2443_v35 = vadd.f32 %v2442_v53, %v5281_v9  ;;  %v2531_v57 = vpop.f32.mrb[54].mxu1  ;;  %v2444_v59 = vpop.f32.mrb[55].mxu0 }
 0x317   : > { %v2990_v60 = vmul.f32 %v5306_v48, %v2918_v51  ;;  %v2989_v17 = vmul.f32 %v5306_v48, %v2917_v52  ;;  %v2532_v62 = vadd.f32 %v2531_v57, %v5281_v9  ;;  %v2445_v63 = vadd.f32 %v2444_v59, %v5281_v9  ;;  %v2533_v0 = vpop.f32.mrb[55].mxu1 }
 0x318   : > { %v3013_v7 = vadd.f32 %v3012_v45, %v2988_v55  ;;  %v2991_v5 = vmul.f32 %v5306_v48, %v2919_v56  ;;  %v2928_v8 = vmax.f32 %v2443_v35, 0.0  ;;  %v2534_v1 = vadd.f32 %v2533_v0, %v5281_v9  ;;  %v3124_v45 = vpop.permute.xlu0 %3123 }
 0x319   : > { %v3031_v12 = vadd.f32 %v3030_v49, %v2990_v60  ;;  %v3022_v14 = vadd.f32 %v3021_v50, %v2989_v17  ;;  %v2930_v44 = vmax.f32 %v2532_v62, 0.0  ;;  %v2929_v15 = vmax.f32 %v2445_v63, 0.0 }
 0x31a   : > { %v3040_v58 = vadd.f32 %v3039_v54, %v2991_v5  ;;  %v3000_v16 = vmul.f32 %v5316_v61, %v2928_v8  ;;  %v2931_v10 = vmax.f32 %v2534_v1, 0.0  ;;  %v3127_v31 = vshrl.u32 %v3126_v20, 7 }
 0x31b   : > { %v3002_v18 = vmul.f32 %v5316_v61, %v2930_v44  ;;  %v3001_v19 = vmul.f32 %v5316_v61, %v2929_v15  ;;  %v4325_v37 = vmov 1966171168  }
 0x31c   : > { %v3014_v22 = vadd.f32 %v3013_v7, %v3000_v16  ;;  %v3003_v23 = vmul.f32 %v5316_v61, %v2931_v10  ;;  %v3159_v38 = vunpack.c.l.s4 %v4325_v37  ;;  %v3128_v42 = vsub.s32 0, %v3127_v31 }
 0x31d   : > { %v3032_v24 = vadd.f32 %v3031_v12, %v3002_v18  ;;  %v3023_v25 = vadd.f32 %v3022_v14, %v3001_v19 }
 0x31e   : > { %v3015_v26 = vrot.slane %v3014_v22, 4  ;;  %v3041_v27 = vadd.f32 %v3040_v58, %v3003_v23  ;;  %v3160_v50 = vunpack.c.0.s8 %v3159_v38  ;;  %v5323_v53 = vrot.slane %v3124_v45, %v3128_v42 }
 0x31f   : > { %v3033_v29 = vrot.slane %v3032_v24, 4  ;;  %v3024_v30 = vrot.slane %v3023_v25, 4 }
 0x320   : > { %v3016_v32 = vadd.f32 %v3015_v26, %v3014_v22  ;;  %v3042_v6 = vrot.slane %v3041_v27, 4  ;;  %v5326_v60 = vsub.s32 %v3160_v50, %v3127_v31 }
 0x321   : > { %v3034_v33 = vadd.f32 %v3033_v29, %v3032_v24  ;;  %v3025_v34 = vadd.f32 %v3024_v30, %v3023_v25 }
 0x322   : > { %v3017_v2 = vrot.slane %v3016_v32, 2  ;;  %v3043_v36 = vadd.f32 %v3042_v6, %v3041_v27 }
 0x323   : > { %v3035_v39 = vrot.slane %v3034_v33, 2  ;;  %v3026_v41 = vrot.slane %v3025_v34, 2 }
 0x324   : > { %v3018_v11 = vadd.f32 %v3017_v2, %v3016_v32  ;;  %v3044_v43 = vrot.slane %v3043_v36, 2 }
 0x325   : > { %v3036_v13 = vadd.f32 %v3035_v39, %v3034_v33  ;;  %v3027_v46 = vadd.f32 %v3026_v41, %v3025_v34 }
 0x326   : > { %v3019_v47 = vrot.slane %v3018_v11, 1  ;;  %v3045_v49 = vadd.f32 %v3044_v43, %v3043_v36 }
 0x327   : > { %v3037_v51 = vrot.slane %v3036_v13, 1  ;;  %v3028_v52 = vrot.slane %v3027_v46, 1 }
 0x328   : > { %v3020_v54 = vadd.f32 %v3019_v47, %v3018_v11  ;;  %v3046_v55 = vrot.slane %v3045_v49, 1 }
 0x329   : > { %v3038_v56 = vadd.f32 %v3037_v51, %v3036_v13  ;;  %v3029_v35 = vadd.f32 %v3028_v52, %v3027_v46 }
 0x32a   : > { %v3130_v57 = vadd.f32 %v5323_v53, %v3020_v54  ;;  %v3047_v59 = vadd.f32 %v3046_v55, %v3045_v49 }
 0x32b   : > { %v3132_v17 = vadd.f32 %v5323_v53, %v3038_v56  ;;  %v3131_v62 = vadd.f32 %v5323_v53, %v3029_v35 }
 0x32c   : > { %v3133_v63 = vadd.f32 %v5323_v53, %v3047_v59 }
 0x32d   : > { %v3154_v0 = vcombine.low %v3130_v57, %v3131_v62 }
 0x32e   : > { %v3155_v7 = vcombine.low %v3132_v17, %v3133_v63 }
 0x32f   : > { %v5332_v5 = vrot.slane %v3154_v0, %v5326_v60 }
 0x330   : > { %v5335_v8 = vrot.slane %v3155_v7, %v5326_v60 }
 0x332   : > { %v3186_v1 = vcombine.low %v5332_v5, %v5335_v8 }
 0x349   : > { %v2602_v12 = vpop.f32.mrb[56].mxu0 }
 0x34a   : > { %v2603_v14 = vadd.f32 %v2602_v12, %v5274_v40  ;;  %v2691_v44 = vpop.f32.mrb[56].mxu1  ;;  %v2604_v15 = vpop.f32.mrb[57].mxu0 }
 0x34b   : > { %v2692_v58 = vadd.f32 %v2691_v44, %v5274_v40  ;;  %v2605_v16 = vadd.f32 %v2604_v15, %v5274_v40  ;;  %v2693_v10 = vpop.f32.mrb[57].mxu1 }
 0x34c   : > { %v2896_v18 = vmax.f32 %v2603_v14, 0.0  ;;  %v2694_v19 = vadd.f32 %v2693_v10, %v5274_v40 }
 0x34d   : > { %v2898_v22 = vmax.f32 %v2692_v58, 0.0  ;;  %v2897_v23 = vmax.f32 %v2605_v16, 0.0  ;;  %v2608_v24 = vpop.f32.mrb[58].mxu0 }
 0x34e   : > { %v2899_v25 = vmax.f32 %v2694_v19, 0.0  ;;  %v2609_v26 = vadd.f32 %v2608_v24, %v5276_v3  ;;  %v2697_v27 = vpop.f32.mrb[58].mxu1  ;;  %v2610_v29 = vpop.f32.mrb[59].mxu0  ;;  %v2968_v6 = vmul.f32 %v5287_v21, %v2896_v18 }
 0x34f   : > { %v2698_v30 = vadd.f32 %v2697_v27, %v5276_v3  ;;  %v2611_v31 = vadd.f32 %v2610_v29, %v5276_v3  ;;  %v2699_v32 = vpop.f32.mrb[59].mxu1  ;;  %v2970_v2 = vmul.f32 %v5287_v21, %v2898_v22  ;;  %v2969_v36 = vmul.f32 %v5287_v21, %v2897_v23 }
 0x350   : > { %v2908_v33 = vmax.f32 %v2609_v26, 0.0  ;;  %v2700_v34 = vadd.f32 %v2699_v32, %v5276_v3  ;;  %v2971_v41 = vmul.f32 %v5287_v21, %v2899_v25 }
 0x351   : > { %v2910_v37 = vmax.f32 %v2698_v30, 0.0  ;;  %v2909_v38 = vmax.f32 %v2611_v31, 0.0  ;;  %v2614_v39 = vpop.f32.mrb[60].mxu0 }
 0x352   : > { %v2980_v42 = vmul.f32 %v5293_v28, %v2908_v33  ;;  %v2911_v11 = vmax.f32 %v2700_v34, 0.0  ;;  %v2615_v43 = vadd.f32 %v2614_v39, %v5278_v4  ;;  %v2703_v45 = vpop.f32.mrb[60].mxu1  ;;  %v2616_v13 = vpop.f32.mrb[61].mxu0 }
 0x353   : > { %v2982_v46 = vmul.f32 %v5293_v28, %v2910_v37  ;;  %v2981_v47 = vmul.f32 %v5293_v28, %v2909_v38  ;;  %v2704_v49 = vadd.f32 %v2703_v45, %v5278_v4  ;;  %v2617_v50 = vadd.f32 %v2616_v13, %v5278_v4  ;;  %v2705_v51 = vpop.f32.mrb[61].mxu1 }
 0x354   : > { %v3048_v52 = vadd.f32 %v2980_v42, %v2968_v6  ;;  %v2983_v54 = vmul.f32 %v5293_v28, %v2911_v11  ;;  %v2920_v55 = vmax.f32 %v2615_v43, 0.0  ;;  %v2706_v56 = vadd.f32 %v2705_v51, %v5278_v4 }
 0x355   : > { %v3066_v35 = vadd.f32 %v2982_v46, %v2970_v2  ;;  %v3057_v57 = vadd.f32 %v2981_v47, %v2969_v36  ;;  %v2922_v59 = vmax.f32 %v2704_v49, 0.0  ;;  %v2921_v17 = vmax.f32 %v2617_v50, 0.0  ;;  %v2620_v62 = vpop.f32.mrb[62].mxu0 }
 0x356   : > { %v3075_v63 = vadd.f32 %v2983_v54, %v2971_v41  ;;  %v2992_v0 = vmul.f32 %v5306_v48, %v2920_v55  ;;  %v2923_v7 = vmax.f32 %v2706_v56, 0.0  ;;  %v2621_v12 = vadd.f32 %v2620_v62, %v5281_v9  ;;  %v2709_v14 = vpop.f32.mrb[62].mxu1  ;;  %v2622_v44 = vpop.f32.mrb[63].mxu0 }
 0x357   : > { %v2994_v15 = vmul.f32 %v5306_v48, %v2922_v59  ;;  %v2993_v58 = vmul.f32 %v5306_v48, %v2921_v17  ;;  %v2710_v16 = vadd.f32 %v2709_v14, %v5281_v9  ;;  %v2623_v10 = vadd.f32 %v2622_v44, %v5281_v9  ;;  %v2711_v18 = vpop.f32.mrb[63].mxu1 }
 0x358   : > { %v3049_v19 = vadd.f32 %v3048_v52, %v2992_v0  ;;  %v2995_v22 = vmul.f32 %v5306_v48, %v2923_v7  ;;  %v2932_v23 = vmax.f32 %v2621_v12, 0.0  ;;  %v2712_v24 = vadd.f32 %v2711_v18, %v5281_v9 }
 0x359   : > { %v3067_v25 = vadd.f32 %v3066_v35, %v2994_v15  ;;  %v3058_v26 = vadd.f32 %v3057_v57, %v2993_v58  ;;  %v2934_v27 = vmax.f32 %v2710_v16, 0.0  ;;  %v2933_v29 = vmax.f32 %v2623_v10, 0.0 }
 0x35a   : > { %v3076_v30 = vadd.f32 %v3075_v63, %v2995_v22  ;;  %v3004_v31 = vmul.f32 %v5316_v61, %v2932_v23  ;;  %v2935_v32 = vmax.f32 %v2712_v24, 0.0  ;;  %v3194_v22 = vrot.slane %v3186_v1, %v5326_v60 }
 0x35b   : > { %v3006_v6 = vmul.f32 %v5316_v61, %v2934_v27  ;;  %v3005_v33 = vmul.f32 %v5316_v61, %v2933_v29 }
 0x35c   : > { %v3050_v34 = vadd.f32 %v3049_v19, %v3004_v31  ;;  %v3007_v2 = vmul.f32 %v5316_v61, %v2935_v32 }
 0x35d   : > { %v3068_v36 = vadd.f32 %v3067_v25, %v3006_v6  ;;  %v3059_v37 = vadd.f32 %v3058_v26, %v3005_v33 }
 0x35e   : > { %v3051_v38 = vrot.slane %v3050_v34, 4  ;;  %v3077_v39 = vadd.f32 %v3076_v30, %v3007_v2 }
 0x35f   : > { %v3069_v41 = vrot.slane %v3068_v36, 4  ;;  %v3060_v42 = vrot.slane %v3059_v37, 4 }
 0x360   : > { %v3052_v11 = vadd.f32 %v3051_v38, %v3050_v34  ;;  %v3078_v43 = vrot.slane %v3077_v39, 4 }
 0x361   : > { %v3070_v45 = vadd.f32 %v3069_v41, %v3068_v36  ;;  %v3061_v13 = vadd.f32 %v3060_v42, %v3059_v37 }
 0x362   : > { %v3053_v46 = vrot.slane %v3052_v11, 2  ;;  %v3079_v47 = vadd.f32 %v3078_v43, %v3077_v39 }
 0x363   : > { %v3071_v49 = vrot.slane %v3070_v45, 2  ;;  %v3062_v50 = vrot.slane %v3061_v13, 2 }
 0x364   : > { %v3054_v51 = vadd.f32 %v3053_v46, %v3052_v11  ;;  %v3080_v52 = vrot.slane %v3079_v47, 2 }
 0x365   : > { %v3072_v54 = vadd.f32 %v3071_v49, %v3070_v45  ;;  %v3063_v55 = vadd.f32 %v3062_v50, %v3061_v13 }
 0x366   : > { %v3055_v56 = vrot.slane %v3054_v51, 1  ;;  %v3081_v35 = vadd.f32 %v3080_v52, %v3079_v47 }
 0x367   : > { %v3073_v57 = vrot.slane %v3072_v54, 1  ;;  %v3064_v59 = vrot.slane %v3063_v55, 1 }
 0x368   : > { %v3056_v17 = vadd.f32 %v3055_v56, %v3054_v51  ;;  %v3082_v62 = vrot.slane %v3081_v35, 1 }
 0x369   : > { %v3074_v63 = vadd.f32 %v3073_v57, %v3072_v54  ;;  %v3065_v0 = vadd.f32 %v3064_v59, %v3063_v55 }
 0x36a   : > { %v3134_v7 = vadd.f32 %v5323_v53, %v3056_v17  ;;  %v3083_v12 = vadd.f32 %v3082_v62, %v3081_v35 }
 0x36b   : > { %v3136_v14 = vadd.f32 %v5323_v53, %v3074_v63  ;;  %v3135_v44 = vadd.f32 %v5323_v53, %v3065_v0 }
 0x36c   : > { %v3137_v15 = vadd.f32 %v5323_v53, %v3083_v12 }
 0x36d   : > { %v3156_v58 = vcombine.low %v3134_v7, %v3135_v44 }
 0x36e   : > { %v3157_v16 = vcombine.low %v3136_v14, %v3137_v15 }
 0x36f   : > { %v3178_v10 = vrot.slane %v3156_v58, %v5326_v60 }
 0x370   : > { %v3185_v18 = vrot.slane %v3157_v16, %v5326_v60 }
 0x372   : > { %v3187_v19 = vcombine.low %v3178_v10, %v3185_v18 }
 0x374   : > { %v3201_v23 = vrot.slane %v3187_v19, %v5326_v60 }
 0x376   : > { %v3202_v24 = vcombine.low %v3194_v22, %v3201_v23 }
 0x378   : > { %3229 = vst [vmem:[%s5385_s19] sm:$0xff] %v3202_v24 }
 0x389   : > { %v2780_v25 = vpop.f32.mrb[64].mxu0 }
 0x38a   : > { %v2781_v26 = vadd.f32 %v2780_v25, %v5274_v40  ;;  %v2869_v27 = vpop.f32.mrb[64].mxu1  ;;  %v2782_v29 = vpop.f32.mrb[65].mxu0 }
 0x38b   : > { %v2870_v30 = vadd.f32 %v2869_v27, %v5274_v40  ;;  %v2783_v31 = vadd.f32 %v2782_v29, %v5274_v40  ;;  %v2871_v32 = vpop.f32.mrb[65].mxu1 }
 0x38c   : > { %v2900_v6 = vmax.f32 %v2781_v26, 0.0  ;;  %v2872_v5 = vadd.f32 %v2871_v32, %v5274_v40 }
 0x38d   : > { %v2902_v8 = vmax.f32 %v2870_v30, 0.0  ;;  %v2901_v1 = vmax.f32 %v2783_v31, 0.0  ;;  %v2786_v33 = vpop.f32.mrb[66].mxu0 }
 0x38e   : > { %v2972_v34 = vmul.f32 %v5287_v21, %v2900_v6  ;;  %v2903_v2 = vmax.f32 %v2872_v5, 0.0  ;;  %v2787_v36 = vadd.f32 %v2786_v33, %v5276_v3  ;;  %v2875_v37 = vpop.f32.mrb[66].mxu1  ;;  %v2788_v38 = vpop.f32.mrb[67].mxu0 }
 0x38f   : > { %v2974_v39 = vmul.f32 %v5287_v21, %v2902_v8  ;;  %v2973_v41 = vmul.f32 %v5287_v21, %v2901_v1  ;;  %v2876_v42 = vadd.f32 %v2875_v37, %v5276_v3  ;;  %v2789_v11 = vadd.f32 %v2788_v38, %v5276_v3  ;;  %v2877_v43 = vpop.f32.mrb[67].mxu1 }
 0x390   : > { %v2975_v40 = vmul.f32 %v5287_v21, %v2903_v2  ;;  %v2912_v45 = vmax.f32 %v2787_v36, 0.0  ;;  %v2878_v13 = vadd.f32 %v2877_v43, %v5276_v3 }
 0x391   : > { %v2914_v46 = vmax.f32 %v2876_v42, 0.0  ;;  %v2913_v47 = vmax.f32 %v2789_v11, 0.0  ;;  %v2792_v49 = vpop.f32.mrb[68].mxu0 }
 0x392   : > { %v2984_v50 = vmul.f32 %v5293_v28, %v2912_v45  ;;  %v2915_v51 = vmax.f32 %v2878_v13, 0.0  ;;  %v2793_v52 = vadd.f32 %v2792_v49, %v5278_v4  ;;  %v2881_v54 = vpop.f32.mrb[68].mxu1  ;;  %v2794_v55 = vpop.f32.mrb[69].mxu0 }
 0x393   : > { %v2986_v56 = vmul.f32 %v5293_v28, %v2914_v46  ;;  %v2985_v35 = vmul.f32 %v5293_v28, %v2913_v47  ;;  %v2882_v57 = vadd.f32 %v2881_v54, %v5278_v4  ;;  %v2795_v21 = vadd.f32 %v2794_v55, %v5278_v4  ;;  %v2883_v59 = vpop.f32.mrb[69].mxu1 }
 0x394   : > { %v3084_v3 = vadd.f32 %v2984_v50, %v2972_v34  ;;  %v2987_v17 = vmul.f32 %v5293_v28, %v2915_v51  ;;  %v2924_v62 = vmax.f32 %v2793_v52, 0.0  ;;  %v2884_v63 = vadd.f32 %v2883_v59, %v5278_v4 }
 0x395   : > { %v3102_v0 = vadd.f32 %v2986_v56, %v2974_v39  ;;  %v3093_v7 = vadd.f32 %v2985_v35, %v2973_v41  ;;  %v2926_v12 = vmax.f32 %v2882_v57, 0.0  ;;  %v2925_v14 = vmax.f32 %v2795_v21, 0.0  ;;  %v2798_v44 = vpop.f32.mrb[70].mxu0 }
 0x396   : > { %v3111_v15 = vadd.f32 %v2987_v17, %v2975_v40  ;;  %v2996_v58 = vmul.f32 %v5306_v48, %v2924_v62  ;;  %v2927_v16 = vmax.f32 %v2884_v63, 0.0  ;;  %v2799_v10 = vadd.f32 %v2798_v44, %v5281_v9  ;;  %v2887_v18 = vpop.f32.mrb[70].mxu1  ;;  %v2800_v19 = vpop.f32.mrb[71].mxu0 }
 0x397   : > { %v2998_v22 = vmul.f32 %v5306_v48, %v2926_v12  ;;  %v2997_v28 = vmul.f32 %v5306_v48, %v2925_v14  ;;  %v2888_v23 = vadd.f32 %v2887_v18, %v5281_v9  ;;  %v2801_v4 = vadd.f32 %v2800_v19, %v5281_v9  ;;  %v2889_v24 = vpop.f32.mrb[71].mxu1 }
 0x398   : > { %v3085_v25 = vadd.f32 %v3084_v3, %v2996_v58  ;;  %v2999_v26 = vmul.f32 %v5306_v48, %v2927_v16  ;;  %v2936_v27 = vmax.f32 %v2799_v10, 0.0  ;;  %v2890_v29 = vadd.f32 %v2889_v24, %v5281_v9 }
 0x399   : > { %v3103_v30 = vadd.f32 %v3102_v0, %v2998_v22  ;;  %v3094_v31 = vadd.f32 %v3093_v7, %v2997_v28  ;;  %v2938_v32 = vmax.f32 %v2888_v23, 0.0  ;;  %v2937_v6 = vmax.f32 %v2801_v4, 0.0 }
 0x39a   : > { %v3112_v5 = vadd.f32 %v3111_v15, %v2999_v26  ;;  %v3008_v8 = vmul.f32 %v5316_v61, %v2936_v27  ;;  %v2939_v1 = vmax.f32 %v2890_v29, 0.0 }
 0x39b   : > { %v3010_v33 = vmul.f32 %v5316_v61, %v2938_v32  ;;  %v3009_v34 = vmul.f32 %v5316_v61, %v2937_v6 }
 0x39c   : > { %v3086_v2 = vadd.f32 %v3085_v25, %v3008_v8  ;;  %v3011_v36 = vmul.f32 %v5316_v61, %v2939_v1 }
 0x39d   : > { %v3104_v37 = vadd.f32 %v3103_v30, %v3010_v33  ;;  %v3095_v48 = vadd.f32 %v3094_v31, %v3009_v34 }
 0x39e   : > { %v3087_v38 = vrot.slane %v3086_v2, 4  ;;  %v3113_v39 = vadd.f32 %v3112_v5, %v3011_v36 }
 0x39f   : > { %v3105_v9 = vrot.slane %v3104_v37, 4  ;;  %v3096_v41 = vrot.slane %v3095_v48, 4 }
 0x3a0   : > { %v3088_v42 = vadd.f32 %v3087_v38, %v3086_v2  ;;  %v3114_v11 = vrot.slane %v3113_v39, 4 }
 0x3a1   : > { %v3106_v43 = vadd.f32 %v3105_v9, %v3104_v37  ;;  %v3097_v40 = vadd.f32 %v3096_v41, %v3095_v48 }
 0x3a2   : > { %v3089_v45 = vrot.slane %v3088_v42, 2  ;;  %v3115_v13 = vadd.f32 %v3114_v11, %v3113_v39 }
 0x3a3   : > { %v3107_v46 = vrot.slane %v3106_v43, 2  ;;  %v3098_v47 = vrot.slane %v3097_v40, 2 }
 0x3a4   : > { %v3090_v49 = vadd.f32 %v3089_v45, %v3088_v42  ;;  %v3116_v50 = vrot.slane %v3115_v13, 2 }
 0x3a5   : > { %v3108_v51 = vadd.f32 %v3107_v46, %v3106_v43  ;;  %v3099_v52 = vadd.f32 %v3098_v47, %v3097_v40 }
 0x3a6   : > { %v3091_v54 = vrot.slane %v3090_v49, 1  ;;  %v3117_v61 = vadd.f32 %v3116_v50, %v3115_v13 }
 0x3a7   : > { %v3109_v55 = vrot.slane %v3108_v51, 1  ;;  %v3100_v56 = vrot.slane %v3099_v52, 1 }
 0x3a8   : > { %v3092_v35 = vadd.f32 %v3091_v54, %v3090_v49  ;;  %v3118_v57 = vrot.slane %v3117_v61, 1 }
 0x3a9   : > { %v3110_v21 = vadd.f32 %v3109_v55, %v3108_v51  ;;  %v3101_v59 = vadd.f32 %v3100_v56, %v3099_v52 }
 0x3aa   : > { %v3138_v3 = vadd.f32 %v5323_v53, %v3092_v35  ;;  %v3119_v17 = vadd.f32 %v3118_v57, %v3117_v61 }
 0x3ab   : > { %v3140_v62 = vadd.f32 %v5323_v53, %v3110_v21  ;;  %v3139_v63 = vadd.f32 %v5323_v53, %v3101_v59 }
 0x3ac   : > { %v3141_v0 = vadd.f32 %v5323_v53, %v3119_v17 }
 0x3ad   : > { %v3203_v7 = vcombine.low %v3138_v3, %v3139_v63 }
 0x3ae   : > { %v3204_v12 = vcombine.low %v3140_v62, %v3141_v0 }
 0x3af   : > { %v3211_v14 = vrot.slane %v3203_v7, %v5326_v60 }
 0x3b0   : > { %v3218_v44 = vrot.slane %v3204_v12, %v5326_v60 }
 0x3b2   : > { %v3219_v15 = vcombine.low %v3211_v14, %v3218_v44 }
 0x3b4   : > { %v3226_v58 = vrot.slane %v3219_v15, %v5326_v60 }
 0x3b6   : > { %3234 = vst.msk [vmem:[%s5385_s19 + $0x8] sm:$0xf] %vm3232_vm3, %v3226_v58 }
 0x3b7   : > { %4272 = shalt.err (!%p4269_p3)
}
 0x3b8   : > { %s4273_s14 = scalar_lea.hbm %s5433_s24, 192  ;;  %s4277_s21 = scalar_lea.hbm %s5485_s7, 384 }
 0x3b9   : > { %p4274_p4 = scmp.ne.s32.totalorder %s5433_s24, %s4273_s14  ;;  %p4278_p9 = scmp.lt.u32.totalorder %s5433_s24, %s5485_s7 }
 0x3ba   : > { %p4279_p10 = scmp.lt.u32.totalorder %s4277_s21, %s4273_s14  ;;  %p4281_p12 = scmp.lt.u32.totalorder %s4273_s14, %s5433_s24 }
 0x3bb   : > { %p4275_p7 = pnand %p4274_p4, %p4405_p5 }
 0x3bc   : > { %p4280_p11 = por %p4279_p10, %p4278_p9 }
 0x3bd   : > { %p4276_p8 = pneg %p4275_p7 }
 0x3be   : > { %p4282_p13 = por %p4281_p12, %p4280_p11 }
 0x3c0   : > { %p4283_p0 = pnand %p4282_p13, %p4276_p8 }
 0x3c2   : > { %4286 = shalt.err (!%p4283_p0)
}
 0x3c3   : > { %4215 = dma.vmem_to_hbm [thread:$0]  (%p4405_p5), %s5435_s20, 192, %s5433_s24, %s3236_s25  }
 0x3c4 PF: > { %p4221_p1 = scmp.ge.s32.totalorder %s4321_s29, 2  ;;  %s3262_s19 = sand.u32 1, %s4309_s26  }
 0x3c5   : > { %s3263_s22 = scalar_lea.sflag [#allocation4], %s3262_s19 }
 0x3c6   : > { %p4218_p2 = pnand %p4221_p1, %p4409_p6 }
 0x3c8   : > { %4304 = dma.done.wait (!%p4218_p2), %s3263_s22, 192  }
 0x3c9   : > { %4306 = vsyncadd (!%p4218_p2), %s3263_s22, 4294967104  ;;  %p19_p3 = scmp.ge.s32.totalorder %s4393_s8, 4   ;;  %s5490_s26 = smov %s4313_s27 }
 0x3ca   : > { %s5491_s27 = smov %s4317_s28  ;;  %s5492_s28 = smov %s4403_s11 }
 0x3cb   : > { %s5493_s29 = smov %s4393_s8  ;;  %21 = sbr.rel (!%p19_p3) target bundleno = 6 (0x6), region = 85 }
 0x3d2   :  { %3268 = vsyncpa [#allocation4], 1 }
 0x3d3   :  { %3270 = vsyncpa [#allocation4 + $0x1], 1 }

</bundles_post_ra>
